<compile_context>
chip_gen: v5e
topology: v5e:2x2
jax: 0.10.0
libtpu: 0.0.40
codegen_flags: <defaults>
</compile_context>

<pallas_src>
import math
import functools

import jax
import jax.numpy as jnp
from jax import lax
from jax.experimental import pallas as pl
from jax.experimental.pallas import tpu as pltpu

# ----------------------------- model config (small) -----------------------------
DIM = 64            # args.dim
N_HEADS = 4         # args.n_heads
N_KV_HEADS = 2      # args.n_kv_heads (GQA)
HEAD_DIM = DIM // N_HEADS            # 16
N_REP = N_HEADS // N_KV_HEADS        # 2
MULTIPLE_OF = 64
NORM_EPS = 1e-5
BATCH = 2
SEQ = 8

DQ = N_HEADS * HEAD_DIM              # 64
DKV = N_KV_HEADS * HEAD_DIM          # 32
QKV_W = DQ + 2 * DKV                 # 128 : [Q heads | K heads | V heads] on lanes
K_OFF = DQ                           # 64
V_OFF = DQ + DKV                     # 96


def _ffn_hidden_dim(dim, multiple_of, ffn_dim_multiplier=None):
    hidden = 4 * dim
    hidden = int(2 * hidden / 3)
    if ffn_dim_multiplier is not None:
        hidden = int(ffn_dim_multiplier * hidden)
    return multiple_of * ((hidden + multiple_of - 1) // multiple_of)


FFN_HIDDEN = _ffn_hidden_dim(DIM, MULTIPLE_OF)         # 192
FFN_PAD = 128 * ((FFN_HIDDEN + 127) // 128)            # 256 (two full 128-lane vregs)


# ----------------------------- fused Pallas kernel --------------------------------
def _encoder_block_kernel(x_ref, na_ref, nf_ref, wqkv2_ref, wo_ref,
                          w13_ref, w2_ref, cos_ref, sin_ref, o_ref,
                          *, eps, batch, seq):
    """Single grid step: the whole block for all batch rows stays in VMEM/vregs."""
    f32, bf16 = jnp.float32, jnp.bfloat16
    x = x_ref[...]                                               # (B*S, D) f32

    # ---- RMSNorm (attention) + fused QKV projection (one 256-lane matmul) ----
    xn = x * lax.rsqrt(jnp.mean(x * x, axis=-1, keepdims=True) + eps)
    xn = (xn * na_ref[...]).astype(bf16)
    # wqkv2T = [qkv | partner-swapped qkv]  -> (B*S, 256) f32 accumulators
    both = jnp.dot(xn, wqkv2_ref[...], preferred_element_type=f32)

    # ---- RoPE as a dense 128-lane FMA (rotate-half; sign + 1/sqrt(hd) folded in) ----
    qkv = both[:, :QKV_W] * cos_ref[...] + both[:, QKV_W:] * sin_ref[...]
    qkv = qkv.astype(bf16)   # single full-width cast; all head slices come from this

    # ---- GQA attention: rep heads stacked on sublanes; one score + one PV matmul
    #      per (batch, kv-head).  Non-causal softmax (matches the PyTorch module).
    per_batch = []
    for b in range(batch):
        r0 = b * seq
        blocks = []
        for kvh in range(N_KV_HEADS):
            h0 = kvh * N_REP
            q_stack = jnp.concatenate(
                [qkv[r0:r0 + seq, (h0 + r) * HEAD_DIM:(h0 + r + 1) * HEAD_DIM]
                 for r in range(N_REP)], axis=0)                 # (N_REP*S, hd) bf16
            k_h = qkv[r0:r0 + seq, K_OFF + kvh * HEAD_DIM:K_OFF + (kvh + 1) * HEAD_DIM]
            v_h = qkv[r0:r0 + seq, V_OFF + kvh * HEAD_DIM:V_OFF + (kvh + 1) * HEAD_DIM]
            s = lax.dot_general(q_stack, k_h, (((1,), (1,)), ((), ())),
                                preferred_element_type=f32)      # (N_REP*S, S)
            s = s - jnp.max(s, axis=-1, keepdims=True)
            p = jnp.exp(s)
            p = p * pl.reciprocal(jnp.sum(p, axis=-1, keepdims=True), approx=True)
            o = jnp.dot(p.astype(bf16), v_h, preferred_element_type=f32)  # (N_REP*S, hd)
            blocks.extend([o[r * seq:(r + 1) * seq, :] for r in range(N_REP)])
        per_batch.append(jnp.concatenate(blocks, axis=1))        # (S, DQ) lane-dense
    attn = jnp.concatenate(per_batch, axis=0).astype(bf16)       # (B*S, DQ)

    # ---- single Wo projection (64-deep contraction) + residual 1 ----
    h1 = x + jnp.dot(attn, wo_ref[...], preferred_element_type=f32)

    # ---- RMSNorm (ffn) + SwiGLU FFN (w1|w3 fused, hidden padded to 256) + residual ----
    hn = h1 * lax.rsqrt(jnp.mean(h1 * h1, axis=-1, keepdims=True) + eps)
    hn = (hn * nf_ref[...]).astype(bf16)
    gu = jnp.dot(hn, w13_ref[...], preferred_element_type=f32)   # (B*S, 512)
    g = gu[:, :FFN_PAD]
    u = gu[:, FFN_PAD:]
    # SiLU in f32; exact reciprocal (tolerance-sensitive: feeds the 192-term w2 sum)
    g = g * pl.reciprocal(1.0 + jnp.exp(-g), approx=False)
    o_ref[...] = h1 + jnp.dot((g * u).astype(bf16), w2_ref[...],
                              preferred_element_type=f32)


# ----------------------------- pallas_call wrapper --------------------------------
def encoder_block_pallas(x, kp):
    """Full EncoderBlock forward (prefill, start_pos=0) as one single-step pallas_call."""
    B, S, D = x.shape
    x2d = x.reshape(B * S, D)   # layout plumbing outside the kernel (contiguous, free)
    kernel = functools.partial(_encoder_block_kernel, eps=NORM_EPS, batch=B, seq=S)

    def full(a):  # whole array as one block, fetched once, resident in VMEM
        return pl.BlockSpec(a.shape, lambda i: (0,) * a.ndim)

    out2d = pl.pallas_call(
        kernel,
        out_shape=jax.ShapeDtypeStruct((B * S, D), jnp.float32),
        grid=(1,),
        in_specs=[
            full(x2d),
            full(kp["norm_att"]), full(kp["norm_ffn"]),
            full(kp["wqkv2T"]), full(kp["woT"]),
            full(kp["w13T"]), full(kp["w2T"]),
            full(kp["cos_tab"]), full(kp["sin_tab"]),
        ],
        out_specs=pl.BlockSpec((B * S, D), lambda i: (0, 0)),
        compiler_params=pltpu.CompilerParams(
            dimension_semantics=("arbitrary",)),
    )(x2d, kp["norm_att"], kp["norm_ffn"], kp["wqkv2T"], kp["woT"],
      kp["w13T"], kp["w2T"], kp["cos_tab"], kp["sin_tab"])
    return out2d.reshape(B, S, D)


# ----------------------------- parameter setup ------------------------------------
def init_params(key):
    ks = jax.random.split(key, 9)
    sd = 1.0 / math.sqrt(DIM)
    sh = 1.0 / math.sqrt(FFN_HIDDEN)
    return {
        "wq": jax.random.normal(ks[0], (DQ, DIM), jnp.float32) * sd,
        "wk": jax.random.normal(ks[1], (DKV, DIM), jnp.float32) * sd,
        "wv": jax.random.normal(ks[2], (DKV, DIM), jnp.float32) * sd,
        "wo": jax.random.normal(ks[3], (DIM, DQ), jnp.float32) * sd,
        "w1": jax.random.normal(ks[4], (FFN_HIDDEN, DIM), jnp.float32) * sd,
        "w2": jax.random.normal(ks[5], (DIM, FFN_HIDDEN), jnp.float32) * sh,
        "w3": jax.random.normal(ks[6], (FFN_HIDDEN, DIM), jnp.float32) * sd,
        "norm_att": 1.0 + 0.1 * jax.random.normal(ks[7], (DIM,), jnp.float32),
        "norm_ffn": 1.0 + 0.1 * jax.random.normal(ks[8], (DIM,), jnp.float32),
    }


def prepare_kernel_params(p, cos, sin, batch):
    """Pre-permute / pre-pack weights and RoPE tables for the fused kernel.

    * Q/K output features are permuted per head from PyTorch's interleaved
      "complex" layout to the rotate-half layout (same permutation on Q and K,
      so attention scores are unchanged; V / Wo are untouched).
    * A partner-swapped copy of the QKV weight columns is appended so RoPE in
      the kernel is a dense (B*S, 128) FMA.  The 32 swapped-V columns are dead
      (zeroed; sin=0 on V lanes) but kept so the FMA stays a full-vreg op.
    * 1/sqrt(head_dim) is folded into the Q lanes of the f32 cos/sin tables.
    * FFN hidden is zero-padded 192->256 and w1|w3 fused into one (D, 512) RHS.
    * Matmul weights are cast to bf16 (MXU-native); accumulation stays f32.
    """
    half = HEAD_DIM // 2
    scale = 1.0 / math.sqrt(HEAD_DIM)
    perm = jnp.concatenate([jnp.arange(0, HEAD_DIM, 2),
                            jnp.arange(1, HEAD_DIM, 2)])

    def permute_heads(w, n_heads):                      # w: (n_heads*hd, D)
        idx = jnp.concatenate([perm + h * HEAD_DIM for h in range(n_heads)])
        return w[idx, :]

    wq_p = permute_heads(p["wq"], N_HEADS)
    wk_p = permute_heads(p["wk"], N_KV_HEADS)
    wqkvT = jnp.concatenate([wq_p.T, wk_p.T, p["wv"].T], axis=1)   # (D, 128)

    # partner(j) = the other half of the same rotation pair inside each head
    partner = []
    for j in range(QKV_W):
        if j < V_OFF:                                    # Q/K columns
            base, off = (j // HEAD_DIM) * HEAD_DIM, j % HEAD_DIM
            partner.append(base + (off + half) % HEAD_DIM)
        else:                                            # V columns (sin = 0 there)
            partner.append(j)
    wqkv_sw = wqkvT[:, jnp.asarray(partner)]
    wqkv_sw = wqkv_sw.at[:, V_OFF:].set(0.0)             # dead swapped-V columns
    wqkv2T = jnp.concatenate([wqkvT, wqkv_sw], axis=1)   # (D, 256)

    # head-replicated, sign-folded cos/sin tables over the 128 qkv lanes
    S = cos.shape[0]
    cos_h = jnp.concatenate([cos, cos], axis=1)          # (S, 16)
    sin_h = jnp.concatenate([-sin, sin], axis=1)         # (S, 16), sign folded
    n_rope_heads = N_HEADS + N_KV_HEADS
    cos_tab = jnp.concatenate(
        [jnp.tile(cos_h, (1, n_rope_heads)), jnp.ones((S, DKV), jnp.float32)], axis=1)
    sin_tab = jnp.concatenate(
        [jnp.tile(sin_h, (1, n_rope_heads)), jnp.zeros((S, DKV), jnp.float32)], axis=1)
    # fold the 1/sqrt(head_dim) score scale into the Q lanes (f32, exact-ish)
    cos_tab = cos_tab.at[:, :DQ].multiply(scale)
    sin_tab = sin_tab.at[:, :DQ].multiply(scale)
    # replicate over the folded batch rows
    cos_tab = jnp.tile(cos_tab, (batch, 1))              # (B*S, 128)
    sin_tab = jnp.tile(sin_tab, (batch, 1))

    # SwiGLU weights: hidden padded to 256, w1 | w3 fused into a single 512-lane RHS
    w1T = jnp.zeros((DIM, FFN_PAD), jnp.float32).at[:, :FFN_HIDDEN].set(p["w1"].T)
    w3T = jnp.zeros((DIM, FFN_PAD), jnp.float32).at[:, :FFN_HIDDEN].set(p["w3"].T)
    w13T = jnp.concatenate([w1T, w3T], axis=1)            # (D, 512)
    w2T = jnp.zeros((FFN_PAD, DIM), jnp.float32).at[:FFN_HIDDEN, :].set(p["w2"].T)

    bf16 = jnp.bfloat16
    return {
        "wqkv2T": wqkv2T.astype(bf16),
        "woT": p["wo"].T.astype(bf16),
        "w13T": w13T.astype(bf16),
        "w2T": w2T.astype(bf16),
        "norm_att": p["norm_att"].reshape(1, DIM),
        "norm_ffn": p["norm_ffn"].reshape(1, DIM),
        "cos_tab": cos_tab,
        "sin_tab": sin_tab,
    }


# ----------------------------- pure-JAX reference ---------------------------------
def encoder_block_ref(x, p, cos, sin, mm_dtype=jnp.float32):
    """Reference for the PyTorch module (interleaved RoPE, GQA, non-causal
    softmax, start_pos=0).  `mm_dtype` is the dtype matmul operands are cast
    to: bf16 mirrors the kernel's MXU policy, f32 is the exact reference."""
    B, S, D = x.shape

    def mm(a, b):
        return jnp.dot(a.astype(mm_dtype), b.astype(mm_dtype),
                       preferred_element_type=jnp.float32)

    def rms(t, w):
        return w * (t * lax.rsqrt(jnp.mean(t * t, -1, keepdims=True) + NORM_EPS))

    xn = rms(x, p["norm_att"])
    q = mm(xn, p["wq"].T).reshape(B, S, N_HEADS, HEAD_DIM)
    k = mm(xn, p["wk"].T).reshape(B, S, N_KV_HEADS, HEAD_DIM)
    v = mm(xn, p["wv"].T).reshape(B, S, N_KV_HEADS, HEAD_DIM)

    def rope(t):
        tr = t.reshape(*t.shape[:-1], HEAD_DIM // 2, 2)
        te, to = tr[..., 0], tr[..., 1]
        c = cos[None, :, None, :]
        s = sin[None, :, None, :]
        return jnp.stack([te * c - to * s, te * s + to * c], axis=-1).reshape(t.shape)

    q, k = rope(q), rope(k)
    k = jnp.repeat(k, N_REP, axis=2)
    v = jnp.repeat(v, N_REP, axis=2)
    q, k, v = (t.transpose(0, 2, 1, 3) for t in (q, k, v))
    scores = jnp.einsum("bhqd,bhkd->bhqk", q.astype(mm_dtype), k.astype(mm_dtype),
                        preferred_element_type=jnp.float32) / math.sqrt(HEAD_DIM)
    probs = jax.nn.softmax(scores, axis=-1)
    o = jnp.einsum("bhqk,bhkd->bhqd", probs.astype(mm_dtype), v.astype(mm_dtype),
                   preferred_element_type=jnp.float32)
    o = o.transpose(0, 2, 1, 3).reshape(B, S, -1)
    h = x + mm(o, p["wo"].T)
    hn = rms(h, p["norm_ffn"])
    g = mm(hn, p["w1"].T)
    g = g * jax.nn.sigmoid(g)
    u = mm(hn, p["w3"].T)
    return h + mm(g * u, p["w2"].T)


# ----------------------------- main -----------------------------------------------
if __name__ == "__main__":
    key = jax.random.PRNGKey(0)
    k_param, k_x = jax.random.split(key)
    params = init_params(k_param)

    x = jax.random.normal(k_x, (BATCH, SEQ, DIM), jnp.float32)

    # freqs_complex equivalent (start_pos = 0): cos/sin of m * theta_i
    inv_freq = 1.0 / (10000.0 ** (jnp.arange(0, HEAD_DIM, 2, dtype=jnp.float32)
                                  / HEAD_DIM))
    t = jnp.arange(SEQ, dtype=jnp.float32)
    freqs = jnp.outer(t, inv_freq)                     # (S, head_dim/2)
    cos, sin = jnp.cos(freqs), jnp.sin(freqs)

    kparams = prepare_kernel_params(params, cos, sin, BATCH)

    out = jax.block_until_ready(encoder_block_pallas(x, kparams))
    assert out.shape == (BATCH, SEQ, DIM)

    # Check against a reference that uses the same bf16-operand / f32-accumulate
    # matmul policy as the kernel.  Budget slightly widened vs. the exact-path
    # version to cover the folded Q-scale rounding point and the approximate
    # (EUP) softmax reciprocal; still tightly bounded by the f32 check below.
    ref_bf = encoder_block_ref(x, params, cos, sin, mm_dtype=jnp.bfloat16)
    err_bf = float(jnp.max(jnp.abs(out - ref_bf)))
    assert jnp.allclose(out, ref_bf, atol=2e-2, rtol=1e-2), err_bf

    # Loose sanity bound against the full-f32 reference (bounds bf16 MXU drift).
    ref_f32 = encoder_block_ref(x, params, cos, sin, mm_dtype=jnp.float32)
    err_f32 = float(jnp.max(jnp.abs(out - ref_f32)))
    assert err_f32 < 2e-1, err_f32

    print("KERNEL_OK")
</pallas_src>

<mosaic_0001>
module attributes {stable_mosaic.version = 11 : i64} {
  func.func @_encoder_block_kernel(%arg0: i32, %arg1: memref<16x64xf32, #tpu.memory_space<vmem>>, %arg2: memref<1x64xf32, #tpu.memory_space<vmem>>, %arg3: memref<1x64xf32, #tpu.memory_space<vmem>>, %arg4: memref<64x256xbf16, #tpu.memory_space<vmem>>, %arg5: memref<64x64xbf16, #tpu.memory_space<vmem>>, %arg6: memref<64x512xbf16, #tpu.memory_space<vmem>>, %arg7: memref<256x64xbf16, #tpu.memory_space<vmem>>, %arg8: memref<16x128xf32, #tpu.memory_space<vmem>>, %arg9: memref<16x128xf32, #tpu.memory_space<vmem>>, %arg10: memref<16x64xf32, #tpu.memory_space<vmem>>) attributes {dimension_semantics = [#tpu.dimension_semantics<arbitrary>], iteration_bounds = array<i64: 1>, scalar_prefetch = 0 : i64, scratch_operands = 0 : i64, tpu.core_type = #tpu.core_type<tc>, window_params = [{pipeline_mode = #tpu.pipeline_mode<synchronous>, transform_indices = @transform_0, window_bounds = array<i64: 16, 64>}, {pipeline_mode = #tpu.pipeline_mode<synchronous>, transform_indices = @transform_1, window_bounds = array<i64: 1, 64>}, {pipeline_mode = #tpu.pipeline_mode<synchronous>, transform_indices = @transform_2, window_bounds = array<i64: 1, 64>}, {pipeline_mode = #tpu.pipeline_mode<synchronous>, transform_indices = @transform_3, window_bounds = array<i64: 64, 256>}, {pipeline_mode = #tpu.pipeline_mode<synchronous>, transform_indices = @transform_4, window_bounds = array<i64: 64, 64>}, {pipeline_mode = #tpu.pipeline_mode<synchronous>, transform_indices = @transform_5, window_bounds = array<i64: 64, 512>}, {pipeline_mode = #tpu.pipeline_mode<synchronous>, transform_indices = @transform_6, window_bounds = array<i64: 256, 64>}, {pipeline_mode = #tpu.pipeline_mode<synchronous>, transform_indices = @transform_7, window_bounds = array<i64: 16, 128>}, {pipeline_mode = #tpu.pipeline_mode<synchronous>, transform_indices = @transform_8, window_bounds = array<i64: 16, 128>}, {pipeline_mode = #tpu.pipeline_mode<synchronous>, transform_indices = @transform_9, window_bounds = array<i64: 16, 64>}]} {
    %c0 = arith.constant 0 : index
    %c0_0 = arith.constant 0 : index
    %0 = vector.load %arg1[%c0, %c0_0] : memref<16x64xf32, #tpu.memory_space<vmem>>, vector<16x64xf32>
    %1 = arith.mulf %0, %0 : vector<16x64xf32>
    %cst = arith.constant dense<0.000000e+00> : vector<16xf32>
    %2 = vector.multi_reduction <add>, %1, %cst [1] : vector<16x64xf32> to vector<16xf32>
    %3 = vector.shape_cast %2 : vector<16xf32> to vector<16x1xf32>
    %cst_1 = arith.constant 6.400000e+01 : f32
    %4 = vector.broadcast %cst_1 : f32 to vector<16x1xf32>
    %5 = arith.divf %3, %4 : vector<16x1xf32>
    %cst_2 = arith.constant 9.99999974E-6 : f32
    %6 = vector.broadcast %cst_2 : f32 to vector<16x1xf32>
    %7 = arith.addf %5, %6 : vector<16x1xf32>
    %8 = math.rsqrt %7 : vector<16x1xf32>
    %9 = vector.broadcast %8 : vector<16x1xf32> to vector<16x64xf32>
    %10 = arith.mulf %0, %9 : vector<16x64xf32>
    %c0_3 = arith.constant 0 : index
    %c0_4 = arith.constant 0 : index
    %11 = vector.load %arg2[%c0_3, %c0_4] : memref<1x64xf32, #tpu.memory_space<vmem>>, vector<1x64xf32>
    %12 = vector.broadcast %11 : vector<1x64xf32> to vector<16x64xf32>
    %13 = arith.mulf %10, %12 : vector<16x64xf32>
    %14 = arith.truncf %13 : vector<16x64xf32> to vector<16x64xbf16>
    %c0_5 = arith.constant 0 : index
    %c0_6 = arith.constant 0 : index
    %15 = vector.load %arg4[%c0_5, %c0_6] : memref<64x256xbf16, #tpu.memory_space<vmem>>, vector<64x256xbf16>
    %cst_7 = arith.constant dense<0.000000e+00> : vector<16x256xf32>
    %16 = tpu.matmul %14, %15, %cst_7 {dimension_numbers = #tpu.dot_dimension_numbers<[1], [0], [0], [1], [0, 0, 1, 1], [], []>} : vector<16x64xbf16>, vector<64x256xbf16>, vector<16x256xf32> -> vector<16x256xf32>
    %17 = vector.extract_strided_slice %16 {offsets = [0, 0], sizes = [16, 128], strides = [1, 1]} : vector<16x256xf32> to vector<16x128xf32>
    %c0_8 = arith.constant 0 : index
    %c0_9 = arith.constant 0 : index
    %18 = vector.load %arg8[%c0_8, %c0_9] : memref<16x128xf32, #tpu.memory_space<vmem>>, vector<16x128xf32>
    %19 = arith.mulf %17, %18 : vector<16x128xf32>
    %20 = vector.extract_strided_slice %16 {offsets = [0, 128], sizes = [16, 128], strides = [1, 1]} : vector<16x256xf32> to vector<16x128xf32>
    %c0_10 = arith.constant 0 : index
    %c0_11 = arith.constant 0 : index
    %21 = vector.load %arg9[%c0_10, %c0_11] : memref<16x128xf32, #tpu.memory_space<vmem>>, vector<16x128xf32>
    %22 = arith.mulf %20, %21 : vector<16x128xf32>
    %23 = arith.addf %19, %22 : vector<16x128xf32>
    %24 = arith.truncf %23 : vector<16x128xf32> to vector<16x128xbf16>
    %25 = vector.extract_strided_slice %24 {offsets = [0, 0], sizes = [8, 16], strides = [1, 1]} : vector<16x128xbf16> to vector<8x16xbf16>
    %26 = vector.extract_strided_slice %24 {offsets = [0, 16], sizes = [8, 16], strides = [1, 1]} : vector<16x128xbf16> to vector<8x16xbf16>
    %27 = tpu.concatenate %25, %26 in 0 : vector<8x16xbf16>, vector<8x16xbf16> -> vector<16x16xbf16>
    %28 = vector.extract_strided_slice %24 {offsets = [0, 64], sizes = [8, 16], strides = [1, 1]} : vector<16x128xbf16> to vector<8x16xbf16>
    %29 = vector.extract_strided_slice %24 {offsets = [0, 96], sizes = [8, 16], strides = [1, 1]} : vector<16x128xbf16> to vector<8x16xbf16>
    %cst_12 = arith.constant dense<0.000000e+00> : vector<16x8xf32>
    %30 = tpu.matmul %27, %28, %cst_12 {dimension_numbers = #tpu.dot_dimension_numbers<[1], [1], [0], [0], [0, 0, 1, 0], [], []>} : vector<16x16xbf16>, vector<8x16xbf16>, vector<16x8xf32> -> vector<16x8xf32>
    %cst_13 = arith.constant dense<0xFF800000> : vector<16xf32>
    %31 = vector.multi_reduction <maximumf>, %30, %cst_13 [1] : vector<16x8xf32> to vector<16xf32>
    %32 = vector.shape_cast %31 : vector<16xf32> to vector<16x1xf32>
    %33 = vector.broadcast %32 : vector<16x1xf32> to vector<16x8xf32>
    %34 = arith.subf %30, %33 : vector<16x8xf32>
    %35 = math.exp %34 : vector<16x8xf32>
    %cst_14 = arith.constant dense<0.000000e+00> : vector<16xf32>
    %36 = vector.multi_reduction <add>, %35, %cst_14 [1] : vector<16x8xf32> to vector<16xf32>
    %37 = vector.shape_cast %36 : vector<16xf32> to vector<16x1xf32>
    %38 = tpu.reciprocal %37 {approx = true} : vector<16x1xf32> -> vector<16x1xf32>
    %39 = vector.broadcast %38 : vector<16x1xf32> to vector<16x8xf32>
    %40 = arith.mulf %35, %39 : vector<16x8xf32>
    %41 = arith.truncf %40 : vector<16x8xf32> to vector<16x8xbf16>
    %cst_15 = arith.constant dense<0.000000e+00> : vector<16x16xf32>
    %42 = tpu.matmul %41, %29, %cst_15 {dimension_numbers = #tpu.dot_dimension_numbers<[1], [0], [0], [1], [0, 0, 1, 1], [], []>} : vector<16x8xbf16>, vector<8x16xbf16>, vector<16x16xf32> -> vector<16x16xf32>
    %43 = vector.extract_strided_slice %42 {offsets = [0, 0], sizes = [8, 16], strides = [1, 1]} : vector<16x16xf32> to vector<8x16xf32>
    %44 = vector.extract_strided_slice %42 {offsets = [8, 0], sizes = [8, 16], strides = [1, 1]} : vector<16x16xf32> to vector<8x16xf32>
    %45 = vector.extract_strided_slice %24 {offsets = [0, 32], sizes = [8, 16], strides = [1, 1]} : vector<16x128xbf16> to vector<8x16xbf16>
    %46 = vector.extract_strided_slice %24 {offsets = [0, 48], sizes = [8, 16], strides = [1, 1]} : vector<16x128xbf16> to vector<8x16xbf16>
    %47 = tpu.concatenate %45, %46 in 0 : vector<8x16xbf16>, vector<8x16xbf16> -> vector<16x16xbf16>
    %48 = vector.extract_strided_slice %24 {offsets = [0, 80], sizes = [8, 16], strides = [1, 1]} : vector<16x128xbf16> to vector<8x16xbf16>
    %49 = vector.extract_strided_slice %24 {offsets = [0, 112], sizes = [8, 16], strides = [1, 1]} : vector<16x128xbf16> to vector<8x16xbf16>
    %cst_16 = arith.constant dense<0.000000e+00> : vector<16x8xf32>
    %50 = tpu.matmul %47, %48, %cst_16 {dimension_numbers = #tpu.dot_dimension_numbers<[1], [1], [0], [0], [0, 0, 1, 0], [], []>} : vector<16x16xbf16>, vector<8x16xbf16>, vector<16x8xf32> -> vector<16x8xf32>
    %cst_17 = arith.constant dense<0xFF800000> : vector<16xf32>
    %51 = vector.multi_reduction <maximumf>, %50, %cst_17 [1] : vector<16x8xf32> to vector<16xf32>
    %52 = vector.shape_cast %51 : vector<16xf32> to vector<16x1xf32>
    %53 = vector.broadcast %52 : vector<16x1xf32> to vector<16x8xf32>
    %54 = arith.subf %50, %53 : vector<16x8xf32>
    %55 = math.exp %54 : vector<16x8xf32>
    %cst_18 = arith.constant dense<0.000000e+00> : vector<16xf32>
    %56 = vector.multi_reduction <add>, %55, %cst_18 [1] : vector<16x8xf32> to vector<16xf32>
    %57 = vector.shape_cast %56 : vector<16xf32> to vector<16x1xf32>
    %58 = tpu.reciprocal %57 {approx = true} : vector<16x1xf32> -> vector<16x1xf32>
    %59 = vector.broadcast %58 : vector<16x1xf32> to vector<16x8xf32>
    %60 = arith.mulf %55, %59 : vector<16x8xf32>
    %61 = arith.truncf %60 : vector<16x8xf32> to vector<16x8xbf16>
    %cst_19 = arith.constant dense<0.000000e+00> : vector<16x16xf32>
    %62 = tpu.matmul %61, %49, %cst_19 {dimension_numbers = #tpu.dot_dimension_numbers<[1], [0], [0], [1], [0, 0, 1, 1], [], []>} : vector<16x8xbf16>, vector<8x16xbf16>, vector<16x16xf32> -> vector<16x16xf32>
    %63 = vector.extract_strided_slice %62 {offsets = [0, 0], sizes = [8, 16], strides = [1, 1]} : vector<16x16xf32> to vector<8x16xf32>
    %64 = vector.extract_strided_slice %62 {offsets = [8, 0], sizes = [8, 16], strides = [1, 1]} : vector<16x16xf32> to vector<8x16xf32>
    %65 = tpu.concatenate %43, %44, %63, %64 in 1 : vector<8x16xf32>, vector<8x16xf32>, vector<8x16xf32>, vector<8x16xf32> -> vector<8x64xf32>
    %66 = vector.extract_strided_slice %24 {offsets = [8, 0], sizes = [8, 16], strides = [1, 1]} : vector<16x128xbf16> to vector<8x16xbf16>
    %67 = vector.extract_strided_slice %24 {offsets = [8, 16], sizes = [8, 16], strides = [1, 1]} : vector<16x128xbf16> to vector<8x16xbf16>
    %68 = tpu.concatenate %66, %67 in 0 : vector<8x16xbf16>, vector<8x16xbf16> -> vector<16x16xbf16>
    %69 = vector.extract_strided_slice %24 {offsets = [8, 64], sizes = [8, 16], strides = [1, 1]} : vector<16x128xbf16> to vector<8x16xbf16>
    %70 = vector.extract_strided_slice %24 {offsets = [8, 96], sizes = [8, 16], strides = [1, 1]} : vector<16x128xbf16> to vector<8x16xbf16>
    %cst_20 = arith.constant dense<0.000000e+00> : vector<16x8xf32>
    %71 = tpu.matmul %68, %69, %cst_20 {dimension_numbers = #tpu.dot_dimension_numbers<[1], [1], [0], [0], [0, 0, 1, 0], [], []>} : vector<16x16xbf16>, vector<8x16xbf16>, vector<16x8xf32> -> vector<16x8xf32>
    %cst_21 = arith.constant dense<0xFF800000> : vector<16xf32>
    %72 = vector.multi_reduction <maximumf>, %71, %cst_21 [1] : vector<16x8xf32> to vector<16xf32>
    %73 = vector.shape_cast %72 : vector<16xf32> to vector<16x1xf32>
    %74 = vector.broadcast %73 : vector<16x1xf32> to vector<16x8xf32>
    %75 = arith.subf %71, %74 : vector<16x8xf32>
    %76 = math.exp %75 : vector<16x8xf32>
    %cst_22 = arith.constant dense<0.000000e+00> : vector<16xf32>
    %77 = vector.multi_reduction <add>, %76, %cst_22 [1] : vector<16x8xf32> to vector<16xf32>
    %78 = vector.shape_cast %77 : vector<16xf32> to vector<16x1xf32>
    %79 = tpu.reciprocal %78 {approx = true} : vector<16x1xf32> -> vector<16x1xf32>
    %80 = vector.broadcast %79 : vector<16x1xf32> to vector<16x8xf32>
    %81 = arith.mulf %76, %80 : vector<16x8xf32>
    %82 = arith.truncf %81 : vector<16x8xf32> to vector<16x8xbf16>
    %cst_23 = arith.constant dense<0.000000e+00> : vector<16x16xf32>
    %83 = tpu.matmul %82, %70, %cst_23 {dimension_numbers = #tpu.dot_dimension_numbers<[1], [0], [0], [1], [0, 0, 1, 1], [], []>} : vector<16x8xbf16>, vector<8x16xbf16>, vector<16x16xf32> -> vector<16x16xf32>
    %84 = vector.extract_strided_slice %83 {offsets = [0, 0], sizes = [8, 16], strides = [1, 1]} : vector<16x16xf32> to vector<8x16xf32>
    %85 = vector.extract_strided_slice %83 {offsets = [8, 0], sizes = [8, 16], strides = [1, 1]} : vector<16x16xf32> to vector<8x16xf32>
    %86 = vector.extract_strided_slice %24 {offsets = [8, 32], sizes = [8, 16], strides = [1, 1]} : vector<16x128xbf16> to vector<8x16xbf16>
    %87 = vector.extract_strided_slice %24 {offsets = [8, 48], sizes = [8, 16], strides = [1, 1]} : vector<16x128xbf16> to vector<8x16xbf16>
    %88 = tpu.concatenate %86, %87 in 0 : vector<8x16xbf16>, vector<8x16xbf16> -> vector<16x16xbf16>
    %89 = vector.extract_strided_slice %24 {offsets = [8, 80], sizes = [8, 16], strides = [1, 1]} : vector<16x128xbf16> to vector<8x16xbf16>
    %90 = vector.extract_strided_slice %24 {offsets = [8, 112], sizes = [8, 16], strides = [1, 1]} : vector<16x128xbf16> to vector<8x16xbf16>
    %cst_24 = arith.constant dense<0.000000e+00> : vector<16x8xf32>
    %91 = tpu.matmul %88, %89, %cst_24 {dimension_numbers = #tpu.dot_dimension_numbers<[1], [1], [0], [0], [0, 0, 1, 0], [], []>} : vector<16x16xbf16>, vector<8x16xbf16>, vector<16x8xf32> -> vector<16x8xf32>
    %cst_25 = arith.constant dense<0xFF800000> : vector<16xf32>
    %92 = vector.multi_reduction <maximumf>, %91, %cst_25 [1] : vector<16x8xf32> to vector<16xf32>
    %93 = vector.shape_cast %92 : vector<16xf32> to vector<16x1xf32>
    %94 = vector.broadcast %93 : vector<16x1xf32> to vector<16x8xf32>
    %95 = arith.subf %91, %94 : vector<16x8xf32>
    %96 = math.exp %95 : vector<16x8xf32>
    %cst_26 = arith.constant dense<0.000000e+00> : vector<16xf32>
    %97 = vector.multi_reduction <add>, %96, %cst_26 [1] : vector<16x8xf32> to vector<16xf32>
    %98 = vector.shape_cast %97 : vector<16xf32> to vector<16x1xf32>
    %99 = tpu.reciprocal %98 {approx = true} : vector<16x1xf32> -> vector<16x1xf32>
    %100 = vector.broadcast %99 : vector<16x1xf32> to vector<16x8xf32>
    %101 = arith.mulf %96, %100 : vector<16x8xf32>
    %102 = arith.truncf %101 : vector<16x8xf32> to vector<16x8xbf16>
    %cst_27 = arith.constant dense<0.000000e+00> : vector<16x16xf32>
    %103 = tpu.matmul %102, %90, %cst_27 {dimension_numbers = #tpu.dot_dimension_numbers<[1], [0], [0], [1], [0, 0, 1, 1], [], []>} : vector<16x8xbf16>, vector<8x16xbf16>, vector<16x16xf32> -> vector<16x16xf32>
    %104 = vector.extract_strided_slice %103 {offsets = [0, 0], sizes = [8, 16], strides = [1, 1]} : vector<16x16xf32> to vector<8x16xf32>
    %105 = vector.extract_strided_slice %103 {offsets = [8, 0], sizes = [8, 16], strides = [1, 1]} : vector<16x16xf32> to vector<8x16xf32>
    %106 = tpu.concatenate %84, %85, %104, %105 in 1 : vector<8x16xf32>, vector<8x16xf32>, vector<8x16xf32>, vector<8x16xf32> -> vector<8x64xf32>
    %107 = tpu.concatenate %65, %106 in 0 : vector<8x64xf32>, vector<8x64xf32> -> vector<16x64xf32>
    %108 = arith.truncf %107 : vector<16x64xf32> to vector<16x64xbf16>
    %c0_28 = arith.constant 0 : index
    %c0_29 = arith.constant 0 : index
    %109 = vector.load %arg5[%c0_28, %c0_29] : memref<64x64xbf16, #tpu.memory_space<vmem>>, vector<64x64xbf16>
    %cst_30 = arith.constant dense<0.000000e+00> : vector<16x64xf32>
    %110 = tpu.matmul %108, %109, %cst_30 {dimension_numbers = #tpu.dot_dimension_numbers<[1], [0], [0], [1], [0, 0, 1, 1], [], []>} : vector<16x64xbf16>, vector<64x64xbf16>, vector<16x64xf32> -> vector<16x64xf32>
    %111 = arith.addf %0, %110 : vector<16x64xf32>
    %112 = arith.mulf %111, %111 : vector<16x64xf32>
    %cst_31 = arith.constant dense<0.000000e+00> : vector<16xf32>
    %113 = vector.multi_reduction <add>, %112, %cst_31 [1] : vector<16x64xf32> to vector<16xf32>
    %114 = vector.shape_cast %113 : vector<16xf32> to vector<16x1xf32>
    %cst_32 = arith.constant 6.400000e+01 : f32
    %115 = vector.broadcast %cst_32 : f32 to vector<16x1xf32>
    %116 = arith.divf %114, %115 : vector<16x1xf32>
    %cst_33 = arith.constant 9.99999974E-6 : f32
    %117 = vector.broadcast %cst_33 : f32 to vector<16x1xf32>
    %118 = arith.addf %116, %117 : vector<16x1xf32>
    %119 = math.rsqrt %118 : vector<16x1xf32>
    %120 = vector.broadcast %119 : vector<16x1xf32> to vector<16x64xf32>
    %121 = arith.mulf %111, %120 : vector<16x64xf32>
    %c0_34 = arith.constant 0 : index
    %c0_35 = arith.constant 0 : index
    %122 = vector.load %arg3[%c0_34, %c0_35] : memref<1x64xf32, #tpu.memory_space<vmem>>, vector<1x64xf32>
    %123 = vector.broadcast %122 : vector<1x64xf32> to vector<16x64xf32>
    %124 = arith.mulf %121, %123 : vector<16x64xf32>
    %125 = arith.truncf %124 : vector<16x64xf32> to vector<16x64xbf16>
    %c0_36 = arith.constant 0 : index
    %c0_37 = arith.constant 0 : index
    %126 = vector.load %arg6[%c0_36, %c0_37] : memref<64x512xbf16, #tpu.memory_space<vmem>>, vector<64x512xbf16>
    %cst_38 = arith.constant dense<0.000000e+00> : vector<16x512xf32>
    %127 = tpu.matmul %125, %126, %cst_38 {dimension_numbers = #tpu.dot_dimension_numbers<[1], [0], [0], [1], [0, 0, 1, 1], [], []>} : vector<16x64xbf16>, vector<64x512xbf16>, vector<16x512xf32> -> vector<16x512xf32>
    %128 = vector.extract_strided_slice %127 {offsets = [0, 0], sizes = [16, 256], strides = [1, 1]} : vector<16x512xf32> to vector<16x256xf32>
    %129 = vector.extract_strided_slice %127 {offsets = [0, 256], sizes = [16, 256], strides = [1, 1]} : vector<16x512xf32> to vector<16x256xf32>
    %cst_39 = arith.constant 0.000000e+00 : f32
    %130 = vector.broadcast %cst_39 : f32 to vector<16x256xf32>
    %131 = arith.subf %130, %128 : vector<16x256xf32>
    %132 = math.exp %131 : vector<16x256xf32>
    %cst_40 = arith.constant 1.000000e+00 : f32
    %133 = vector.broadcast %cst_40 : f32 to vector<16x256xf32>
    %134 = arith.addf %133, %132 : vector<16x256xf32>
    %135 = tpu.reciprocal %134 : vector<16x256xf32> -> vector<16x256xf32>
    %136 = arith.mulf %128, %135 : vector<16x256xf32>
    %137 = arith.mulf %136, %129 : vector<16x256xf32>
    %138 = arith.truncf %137 : vector<16x256xf32> to vector<16x256xbf16>
    %c0_41 = arith.constant 0 : index
    %c0_42 = arith.constant 0 : index
    %139 = vector.load %arg7[%c0_41, %c0_42] : memref<256x64xbf16, #tpu.memory_space<vmem>>, vector<256x64xbf16>
    %cst_43 = arith.constant dense<0.000000e+00> : vector<16x64xf32>
    %140 = tpu.matmul %138, %139, %cst_43 {dimension_numbers = #tpu.dot_dimension_numbers<[1], [0], [0], [1], [0, 0, 1, 1], [], []>} : vector<16x256xbf16>, vector<256x64xbf16>, vector<16x64xf32> -> vector<16x64xf32>
    %141 = arith.addf %111, %140 : vector<16x64xf32>
    %c0_44 = arith.constant 0 : index
    %c0_45 = arith.constant 0 : index
    %142 = vector.load %arg10[%c0_44, %c0_45] : memref<16x64xf32, #tpu.memory_space<vmem>>, vector<16x64xf32>
    tpu.vector_store %arg10[%c0_44, %c0_45], %141 {strides = array<i32>} : memref<16x64xf32, #tpu.memory_space<vmem>>, vector<16x64xf32>,
    return
  }
  func.func @transform_0(%arg0: i32) -> (i32, i32) {
    %c0_i32 = arith.constant 0 : i32
    %c0_i32_0 = arith.constant 0 : i32
    %c0_i32_1 = arith.constant 0 : i32
    return %c0_i32, %c0_i32_0 : i32, i32
  }
  func.func @transform_1(%arg0: i32) -> (i32, i32) {
    %c0_i32 = arith.constant 0 : i32
    %c0_i32_0 = arith.constant 0 : i32
    %c0_i32_1 = arith.constant 0 : i32
    return %c0_i32, %c0_i32_0 : i32, i32
  }
  func.func @transform_2(%arg0: i32) -> (i32, i32) {
    %c0_i32 = arith.constant 0 : i32
    %c0_i32_0 = arith.constant 0 : i32
    %c0_i32_1 = arith.constant 0 : i32
    return %c0_i32, %c0_i32_0 : i32, i32
  }
  func.func @transform_3(%arg0: i32) -> (i32, i32) {
    %c0_i32 = arith.constant 0 : i32
    %c0_i32_0 = arith.constant 0 : i32
    %c0_i32_1 = arith.constant 0 : i32
    return %c0_i32, %c0_i32_0 : i32, i32
  }
  func.func @transform_4(%arg0: i32) -> (i32, i32) {
    %c0_i32 = arith.constant 0 : i32
    %c0_i32_0 = arith.constant 0 : i32
    %c0_i32_1 = arith.constant 0 : i32
    return %c0_i32, %c0_i32_0 : i32, i32
  }
  func.func @transform_5(%arg0: i32) -> (i32, i32) {
    %c0_i32 = arith.constant 0 : i32
    %c0_i32_0 = arith.constant 0 : i32
    %c0_i32_1 = arith.constant 0 : i32
    return %c0_i32, %c0_i32_0 : i32, i32
  }
  func.func @transform_6(%arg0: i32) -> (i32, i32) {
    %c0_i32 = arith.constant 0 : i32
    %c0_i32_0 = arith.constant 0 : i32
    %c0_i32_1 = arith.constant 0 : i32
    return %c0_i32, %c0_i32_0 : i32, i32
  }
  func.func @transform_7(%arg0: i32) -> (i32, i32) {
    %c0_i32 = arith.constant 0 : i32
    %c0_i32_0 = arith.constant 0 : i32
    %c0_i32_1 = arith.constant 0 : i32
    return %c0_i32, %c0_i32_0 : i32, i32
  }
  func.func @transform_8(%arg0: i32) -> (i32, i32) {
    %c0_i32 = arith.constant 0 : i32
    %c0_i32_0 = arith.constant 0 : i32
    %c0_i32_1 = arith.constant 0 : i32
    return %c0_i32, %c0_i32_0 : i32, i32
  }
  func.func @transform_9(%arg0: i32) -> (i32, i32) {
    %c0_i32 = arith.constant 0 : i32
    %c0_i32_0 = arith.constant 0 : i32
    %c0_i32_1 = arith.constant 0 : i32
    return %c0_i32, %c0_i32_0 : i32, i32
  }
}

</mosaic_0001>

<bundles_post_ra>
// kernel: tpu_custom_call.1
= control target key start
LH: loop header
LB: loop body
LE: loop exit
PB: predicated region body
PF: predicated region fallthrough
CT: control target
= control target key end

     0   :  { %14 = vsyncpa [#allocation3], 0  ;;  %s1968_s0 = inlined_call_operand.hbm [shape: f32[16,64], index: 0, kind: input, shape index: {}]   ;;  %s1969_s1 = inlined_call_operand.vmem [shape: f32[1,64], index: 1, kind: input, shape index: {}]   ;;  %s1970_s2 = inlined_call_operand.vmem [shape: f32[1,64], index: 2, kind: input, shape index: {}]   ;;  %s1971_s3 = inlined_call_operand.vmem [shape: bf16[64,256], index: 3, kind: input, shape index: {}]   ;;  %s1972_s4 = inlined_call_operand.hbm [shape: bf16[64,64], index: 4, kind: input, shape index: {}]   ;;  %s1973_s5 = inlined_call_operand.vmem [shape: bf16[64,512], index: 5, kind: input, shape index: {}]   ;;  %s1974_s6 = inlined_call_operand.vmem [shape: bf16[256,64], index: 6, kind: input, shape index: {}]   ;;  %s1975_s7 = inlined_call_operand.hbm [shape: f32[16,128], index: 7, kind: input, shape index: {}]   ;;  %s1976_s8 = inlined_call_operand.hbm [shape: f32[16,128], index: 8, kind: input, shape index: {}]   ;;  %s1977_s9 = inlined_call_operand.hbm [shape: f32[16,64], index: 9, kind: output, shape index: {}]  }
   0x1   :  { %15 = vsyncpa [#allocation6], 0 }
   0x2   :  { %16 = vsyncpa [#allocation9], 0  ;;  %s41_s11 = sshll.u32 %s1972_s4, 4  ;;  %s42_s11 = int_to_ptr.hbm [resolvable:$true] %s41_s11 }
   0x3   :  { %17 = vsyncpa [#allocation4], 0  ;;  %s1526_s12 = smov [#allocation5]   ;;  %s22_s16 = sshll.u32 %s1968_s0, 4  ;;  %s23_s16 = int_to_ptr.hbm [resolvable:$true] %s22_s16 }
   0x4   :  { %s43_s13 = sshll.u32 %s1526_s12, 4  ;;  %s1527_s17 = smov 64   ;;  %s44_s13 = int_to_ptr.vmem [resolvable:$true] %s43_s13 }
   0x5   :  { %s1528_s18 = smov 4   ;;  %s1529_s19 = smov [#allocation2]  }
   0x6   :  { %49 = dma.hbm_to_vmem [thread:$0]  %s42_s11, 512, %s44_s13, [#allocation6], %s1527_s17, %s1527_s17, %s1528_s18  }
   0x7   :  { %s24_s20 = sshll.u32 %s1529_s19, 4  ;;  %s1530_s21 = smov 128   ;;  %s25_s20 = int_to_ptr.vmem [resolvable:$true] %s24_s20 }
   0x8   :  { %s1531_s4 = smov 8   ;;  %s58_s24 = sshll.u32 %s1975_s7, 4  ;;  %s59_s24 = int_to_ptr.hbm [resolvable:$true] %s58_s24 }
   0x9   :  { %30 = dma.hbm_to_vmem [thread:$0]  %s23_s16, 256, %s25_s20, [#allocation3], %s1530_s21, %s1530_s21, %s1531_s4  }
   0xa   :  { %s1532_s0 = smov [#allocation7]   ;;  %s71_s28 = sshll.u32 %s1976_s8, 4  ;;  %s72_s28 = int_to_ptr.hbm [resolvable:$true] %s71_s28 }
   0xb   :  { %s60_s25 = sshll.u32 %s1532_s0, 4  ;;  %s1533_s29 = smov [#allocation8]   ;;  %s61_s25 = int_to_ptr.vmem [resolvable:$true] %s60_s25 }
   0xc   :  { %66 = dma.hbm_to_vmem [thread:$0]  %s59_s24, 256, %s61_s25, [#allocation6], %s1530_s21, %s1530_s21, %s1531_s4  }
   0xd   :  { %s73_s30 = sshll.u32 %s1533_s29, 4  ;;  %s74_s30 = int_to_ptr.vmem [resolvable:$true] %s73_s30 }
   0xe   :  { %79 = dma.hbm_to_vmem [thread:$0]  %s72_s28, 256, %s74_s30, [#allocation9], %s1530_s21, %s1530_s21, %s1531_s4  }
   0xf   :  { %1518 = dma.done.wait [#allocation3], 256  }
  0x10   :  { %1519 = vsyncadd [#allocation3], 4294967040 }
  0x11   :  { %1520 = dma.done.wait [#allocation6], 768  }
  0x12   :  { %1521 = vsyncadd [#allocation6], 4294966528 }
  0x13   :  { %1522 = dma.done.wait [#allocation9], 256  }
  0x14   :  { %1523 = vsyncadd [#allocation9], 4294967040  ;;  %v1614_v0 = vld [vmem:[#allocation2] sm:$0xff]  ;;  %vm101_vm0 = vcmask 523264   ;;  %v1618_v2 = vld [vmem:[#allocation2 + $0x8] sm:$0xff]  ;;  %v1534_v6 = vmov 64.0  }
  0x15   :  { %v99_v1 = vmul.f32 %v1614_v0, %v1614_v0  ;;  %v100_v4 = vmul.f32 %v1618_v2, %v1618_v2  ;;  %1340 = vrcp.f32 %v1534_v6  ;;  %v1099_v10 = vld [vmem:[%s1971_s3 + $0x30] sm:$0xf]  ;;  %v1271_v11 = vld [vmem:[%s1971_s3 + $0x34] sm:$0xf0]  ;;  %v1270_v12 = vld [vmem:[%s1971_s3 + $0x34] sm:$0xf] }
  0x16   :  { %v1100_v13 = vor.u32 %v1271_v11, %v1099_v10  ;;  %v1101_v14 = vld [vmem:[%s1971_s3 + $0x38] sm:$0xf0]  ;;  %v1091_v17 = vld [vmem:[%s1971_s3 + $0x20] sm:$0xf]  ;;  %v1269_v18 = vld [vmem:[%s1971_s3 + $0x24] sm:$0xf0] }
  0x17   :  { %v102_v3 = vsel %vm101_vm0, %v99_v1, 0.0  ;;  %v105_v5 = vsel %vm101_vm0, %v100_v4, 0.0  ;;  %v1104_v15 = vor.u32 %v1270_v12, %v1101_v14  ;;  %v1268_v19 = vld [vmem:[%s1971_s3 + $0x24] sm:$0xf]  ;;  %v1092_v20 = vor.u32 %v1269_v18, %v1091_v17  ;;  %v1093_v21 = vld [vmem:[%s1971_s3 + $0x28] sm:$0xf0] }
  0x18   :  { %103 = vadd.xlane.f32.xlu0 %v102_v3  ;;  %203 = vmatpush.bf16.msra.mxu0 %v1100_v13  ;;  %v1096_v22 = vor.u32 %v1268_v19, %v1093_v21  ;;  %v1083_v24 = vld [vmem:[%s1971_s3 + $0x10] sm:$0xf]  ;;  %v1267_v25 = vld [vmem:[%s1971_s3 + $0x14] sm:$0xf0]  ;;  %v1266_v26 = vld [vmem:[%s1971_s3 + $0x14] sm:$0xf] }
  0x19   :  { %217 = vmatpush.bf16.msra.mxu1 %v1104_v15  ;;  %v1084_v27 = vor.u32 %v1267_v25, %v1083_v24  ;;  %v1085_v28 = vld [vmem:[%s1971_s3 + $0x18] sm:$0xf0]  ;;  %v1075_v31 = vld [vmem:[%s1971_s3] sm:$0xf]  ;;  %v1265_v32 = vld [vmem:[%s1971_s3 + $0x4] sm:$0xf0] }
  0x1a   :  { %v1088_v29 = vor.u32 %v1266_v26, %v1085_v28  ;;  %v1264_v33 = vld [vmem:[%s1971_s3 + $0x4] sm:$0xf]  ;;  %v1076_v34 = vor.u32 %v1265_v32, %v1075_v31  ;;  %v1077_v35 = vld [vmem:[%s1971_s3 + $0x8] sm:$0xf0]  ;;  %v1338_v57 = vld [vmem:[%s1969_s1] ss:$0 sm:$0xff] }
  0x1b   :  { %v1341_v7 = vpop.eup %1340  ;;  %v1080_v37 = vor.u32 %v1264_v33, %v1077_v35  ;;  %v227_v63 = vld [vmem:[#allocation7] sm:$0xff]  ;;  %v231_v1 = vld [vmem:[#allocation8] sm:$0xff]  ;;  %v232_v10 = vld [vmem:[#allocation8 + $0x8] sm:$0xff]  ;;  %s1535_s1 = smov 112   ;;  %s1536_s20 = smov 48   ;;  %vm244_vm8 = vcmask 1043456  }
  0x1c   :  { %v109_v8 = vmul.f32 64.0, %v1341_v7  ;;  %204 = vmatpush.bf16.msra.mxu0 %v1092_v20  ;;  %vm113_vm1 = vweird.f32 %v1341_v7  ;;  %s1537_s22 = smov 96   ;;  %vm250_vm9 = vcmask 130048   ;;  %vm270_vm10 = vcmask 64512   ;;  %s1539_s23 = smov 16  }
  0x1d   :  { %218 = vmatpush.bf16.msra.mxu1 %v1096_v22  ;;  %vm399_vm11 = vcmask 261120   ;;  %vm401_vm12 = vcmask 392192  }
  0x1e   :  { %v110_v9 = vsub.f32 1.0, %v109_v8 }
  0x20   :  { %106 = vadd.xlane.f32.xlu0 %v105_v5  ;;  %v111_v16 = vmul.f32 %v1341_v7, %v110_v9  ;;  %205 = vmatpush.bf16.msra.mxu0 %v1084_v27  ;;  %v228_v9 = vld [vmem:[#allocation7 + $0x8] sm:$0xff] }
  0x21   :  { %219 = vmatpush.bf16.msra.mxu1 %v1088_v29 }
  0x22   :  { %v112_v23 = vadd.f32 %v1341_v7, %v111_v16 }
  0x24   :  { %v1660_v30 = vsel %vm113_vm1, %v1341_v7, %v112_v23  ;;  %206 = vmatpush.bf16.msra.mxu0 %v1076_v34 }
  0x25   :  { %220 = vmatpush.bf16.msra.mxu1 %v1080_v37 }
  0x8b   :  { %v104_v36 = vpop.xlane.xlu0 %103 }
  0x8c   :  { %v115_v38 = vmul.f32 %v1660_v30, %v104_v36 }
  0x8e   :  { %v117_v39 = vadd.f32 1e-05, %v115_v38 }
  0x90   :  { %1342 = vrsqrt.f32 %v117_v39  ;;  %vm125_vm3 = vweird.f32 %v117_v39 }
  0x93   :  { %v107_v40 = vpop.xlane.xlu0 %106 }
  0x94   :  { %v116_v41 = vmul.f32 %v1660_v30, %v107_v40 }
  0x96   :  { %v1343_v42 = vpop.eup %1342  ;;  %v118_v43 = vadd.f32 1e-05, %v116_v41 }
  0x97   :  { %v120_v44 = vmul.f32 %v1343_v42, %v117_v39  ;;  %vm126_vm2 = vweird.f32 %v1343_v42 }
  0x98   :  { %1344 = vrsqrt.f32 %v118_v43  ;;  %vm127_vm4 = vmor %vm125_vm3, %vm126_vm2  ;;  %vm135_vm6 = vweird.f32 %v118_v43 }
  0x99   :  { %v121_v45 = vmul.f32 %v1343_v42, %v120_v44 }
  0x9b   :  { %v122_v46 = vmul.f32 0.5, %v121_v45 }
  0x9d   :  { %v123_v47 = vsub.f32 1.5, %v122_v46 }
  0x9e   :  { %v1345_v48 = vpop.eup %1344 }
  0x9f   :  { %v130_v49 = vmul.f32 %v1345_v48, %v118_v43  ;;  %v124_v50 = vmul.f32 %v1343_v42, %v123_v47  ;;  %vm136_vm5 = vweird.f32 %v1345_v48 }
  0xa0   :  { %vm137_vm7 = vmor %vm135_vm6, %vm136_vm5 }
  0xa1   :  { %v131_v51 = vmul.f32 %v1345_v48, %v130_v49  ;;  %v128_v53 = vsel %vm127_vm4, %v1343_v42, %v124_v50 }
  0xa2   :  { %v139_v56 = vmul.f32 %v128_v53, %v1614_v0 }
  0xa3   :  { %v132_v52 = vmul.f32 0.5, %v131_v51 }
  0xa4   :  { %v145_v60 = vmul.f32 %v1338_v57, %v139_v56 }
  0xa5   :  { %v133_v54 = vsub.f32 1.5, %v132_v52 }
  0xa7   :  { %v134_v55 = vmul.f32 %v1345_v48, %v133_v54 }
  0xa9   :  { %v138_v58 = vsel %vm137_vm7, %v1345_v48, %v134_v55 }
  0xaa   :  { %v140_v59 = vmul.f32 %v138_v58, %v1618_v2 }
  0xac   :  { %v146_v61 = vmul.f32 %v1338_v57, %v140_v59 }
  0xae   :  { %v147_v62 = vpack.c.bf16 %v146_v61, %v145_v60 }
  0xb0   :  { %1105 = vmatmul.msk.bf16.vlgmr.msra.gmra.mxu0 %vm101_vm0, %v147_v62  ;;  %1106 = vmatmul.msk.bf16.vlgmr.msra.gmra.mxu1 %vm101_vm0, %v147_v62 }
 0x12d   :  { %v208_v3 = vpop.f32.mrf.mxu0  ;;  %v222_v4 = vpop.f32.mrf.mxu1 }
 0x12e   :  { %v229_v5 = vmul.f32 %v227_v63, %v208_v3  ;;  %v233_v6 = vmul.f32 %v231_v1, %v222_v4 }
 0x130   :  { %v235_v7 = vadd.f32 %v233_v6, %v229_v5 }
 0x132   :  { %v237_v8 = vpack.c.bf16 %v235_v7, %v235_v7 }
 0x134   :  { %v240_v11 = vunpack.c.l.b16 %v237_v8 }
 0x135   :  { %v210_v12 = vpop.f32.mrf.mxu0  ;;  %v224_v13 = vpop.f32.mrf.mxu1 }
 0x136   :  { %v1683_v14 = vpack.c.b16 %v240_v11, %v240_v11  ;;  %v230_v15 = vmul.f32 %v228_v9, %v210_v12  ;;  %v234_v16 = vmul.f32 %v232_v10, %v224_v13 }
 0x138   :  { %v236_v17 = vadd.f32 %v234_v16, %v230_v15  ;;  %242 = vrot.lane.b32.xlu1 %v1683_v14, %s1535_s1 }
 0x13a   :  { %v238_v18 = vpack.c.bf16 %v236_v17, %v236_v17 }
 0x13c   :  { %v404_v19 = vunpack.c.l.b16 %v238_v18 }
 0x13e   :  { %v1686_v20 = vpack.c.b16 %v404_v19, %v404_v19 }
 0x140   :  { %248 = vrot.lane.b32.xlu1 %v1683_v14, %s1527_s17  ;;  %406 = vrot.lane.b32.xlu2 %v1686_v20, %s1535_s1 }
 0x148   :  { %480 = vrot.lane.b32.xlu1 %v1686_v20, %s1536_s20  ;;  %319 = vrot.lane.b32.xlu2 %v1683_v14, %s1536_s20 }
 0x150   :  { %411 = vrot.lane.b32.xlu1 %v1686_v20, %s1527_s17  ;;  %s1538_s17 = smov 32  }
 0x19a   :  { %v407_v21 = vpop.permute.xlu2 %406 }
 0x19b   :  { %v410_v22 = vsel %vm244_vm8, %v238_v18, %v407_v21 }
 0x19c   :  { %478 = vrot.lane.b32.xlu2 %v410_v22, %s1537_s22 }
 0x1a2   :  { %v320_v23 = vpop.permute.xlu2 %319 }
 0x1a3   :  { %v325_v24 = vsel %vm250_vm9, %v320_v23, 0 }
 0x1a4   :  { %334 = vmatpush.bf16.xpose.msra.mxu3 %v325_v24 }
 0x1aa   :  { %v243_v25 = vpop.permute.xlu1 %242 }
 0x1ab   :  { %v247_v26 = vsel %vm244_vm8, %v237_v8, %v243_v25 }
 0x1ac   :  { %317 = vrot.lane.b32.xlu0 %v247_v26, %s1537_s22  ;;  %s1058_s22 = sshll.u32 %s1977_s9, 4  ;;  %s1059_s22 = int_to_ptr.hbm [resolvable:$true] %s1058_s22 }
 0x1b2   :  { %v249_v27 = vpop.permute.xlu1 %248 }
 0x1b3   :  { %v254_v28 = vsel %vm250_vm9, %v249_v27, 0 }
 0x1b4   :  { %263 = vmatpush.bf16.xpose.msra.mxu2 %v254_v28 }
 0x1ba   :  { %v481_v29 = vpop.permute.xlu1 %480 }
 0x1bb   :  { %1107 = vmatmul.msk.bf16.vlgmr.msra.gmra.mxu2 %vm250_vm9, %v247_v26  ;;  %v486_v31 = vsel %vm250_vm9, %v481_v29, 0 }
 0x1bc   :  { %495 = vmatpush.bf16.xpose.msrb.mxu3 %v486_v31 }
 0x1c2   :  { %v412_v32 = vpop.permute.xlu1 %411 }
 0x1c3   :  { %v416_v33 = vsel %vm250_vm9, %v412_v32, 0 }
 0x1c4   :  { %425 = vmatpush.bf16.xpose.msrb.mxu0 %v416_v33 }
 0x1cb   :  { %1111 = vmatmul.msk.bf16.vlgmr.msrb.gmra.mxu0 %vm250_vm9, %v410_v22 }
 0x1f6   :  { %v479_v35 = vpop.permute.xlu2 %478 }
 0x21e   :  { %v318_v34 = vpop.permute.xlu0 %317 }
 0x21f   :  { %1109 = vmatmul.msk.bf16.vlgmr.msra.gmra.mxu3 %vm250_vm9, %v318_v34 }
 0x22f   :  { %1113 = vmatmul.msk.bf16.vlgmr.msrb.gmra.mxu3 %vm250_vm9, %v479_v35 }
 0x23e   :  { %v265_v36 = vpop.f32.mrf.mxu2 }
 0x23f   :  { %v271_v37 = vsel %vm270_vm10, %v265_v36, -inf }
 0x240   :  { %272 = vmax.xlane.f32.xlu2 %v271_v37 }
 0x246   :  { %v267_v38 = vpop.f32.mrf.mxu2 }
 0x247   :  { %v274_v39 = vsel %vm270_vm10, %v267_v38, -inf }
 0x248   :  { %275 = vmax.xlane.f32.xlu1 %v274_v39  ;;  %v427_v40 = vpop.f32.mrf.mxu0 }
 0x249   :  { %v432_v41 = vsel %vm270_vm10, %v427_v40, -inf }
 0x24a   :  { %433 = vmax.xlane.f32.xlu0 %v432_v41 }
 0x250   :  { %v429_v42 = vpop.f32.mrf.mxu0 }
 0x251   :  { %v435_v43 = vsel %vm270_vm10, %v429_v42, -inf }
 0x252   :  { %436 = vmax.xlane.f32.xlu2 %v435_v43 }
 0x2a2   :  { %v336_v44 = vpop.f32.mrf.mxu3 }
 0x2a3   :  { %v341_v45 = vsel %vm270_vm10, %v336_v44, -inf }
 0x2a4   :  { %342 = vmax.xlane.f32.xlu0 %v341_v45 }
 0x2aa   :  { %v338_v46 = vpop.f32.mrf.mxu3 }
 0x2ab   :  { %v344_v47 = vsel %vm270_vm10, %v338_v46, -inf }
 0x2ac   :  { %345 = vmax.xlane.f32.xlu2 %v344_v47 }
 0x2b2   :  { %v497_v48 = vpop.f32.mrf.mxu3 }
 0x2b3   :  { %v273_v49 = vpop.xlane.xlu2 %272  ;;  %v502_v50 = vsel %vm270_vm10, %v497_v48, -inf }
 0x2b4   :  { %v277_v51 = vsub.f32 %v265_v36, %v273_v49  ;;  %503 = vmax.xlane.f32.xlu2 %v502_v50 }
 0x2b6   :  { %v279_v52 = vmul.f32 1.442695, %v277_v51 }
 0x2b8   :  { %1346 = vpow2.f32 %v279_v52 }
 0x2ba   :  { %v499_v58 = vpop.f32.mrf.mxu3 }
 0x2bb   :  { %v276_v53 = vpop.xlane.xlu1 %275  ;;  %v505_v63 = vsel %vm270_vm10, %v499_v58, -inf }
 0x2bc   :  { %v278_v54 = vsub.f32 %v267_v38, %v276_v53 }
 0x2bd   :  { %v434_v5 = vpop.xlane.xlu0 %433 }
 0x2be   :  { %v1714_v55 = vpop.eup %1346  ;;  %v281_v56 = vmul.f32 1.442695, %v278_v54  ;;  %v438_v6 = vsub.f32 %v427_v40, %v434_v5 }
 0x2bf   :  { %v283_v57 = vsel %vm270_vm10, %v1714_v55, 0.0 }
 0x2c0   :  { %1348 = vpow2.f32 %v281_v56  ;;  %284 = vadd.xlane.f32.xlu1 %v283_v57  ;;  %v440_v7 = vmul.f32 1.442695, %v438_v6 }
 0x2c5   :  { %v437_v59 = vpop.xlane.xlu2 %436 }
 0x2c6   :  { %v1349_v60 = vpop.eup %1348  ;;  %v439_v61 = vsub.f32 %v429_v42, %v437_v59 }
 0x2c7   :  { %v286_v62 = vsel %vm270_vm10, %v1349_v60, 0.0 }
 0x2c8   :  { %v442_v1 = vmul.f32 1.442695, %v439_v61  ;;  %287 = vadd.xlane.f32.xlu0 %v286_v62  ;;  %506 = vmax.xlane.f32.xlu1 %v505_v63 }
 0x2ca   :  { %1350 = vpow2.f32 %v442_v1 }
 0x2cb   :  { %1352 = vpow2.f32 %v440_v7 }
 0x2cc   :  { %294 = vrot.lane.b32.xlu2 %v1683_v14, %s1538_s17 }
 0x2d0   :  { %v1722_v3 = vpop.eup %1350 }
 0x2d1   :  { %v447_v4 = vsel %vm270_vm10, %v1722_v3, 0.0  ;;  %v1728_v8 = vpop.eup %1352 }
 0x2d2   :  { %448 = vadd.xlane.f32.xlu0 %v447_v4  ;;  %v444_v9 = vsel %vm270_vm10, %v1728_v8, 0.0 }
 0x2e1   :  { %364 = vrot.lane.b32.xlu1 %v1683_v14, %s1539_s23 }
 0x2f5   :  { %445 = vadd.xlane.f32.xlu2 %v444_v9 }
 0x317   :  { %v343_v10 = vpop.xlane.xlu0 %342 }
 0x318   :  { %v347_v11 = vsub.f32 %v336_v44, %v343_v10 }
 0x31a   :  { %v349_v12 = vmul.f32 1.442695, %v347_v11 }
 0x31c   :  { %1354 = vpow2.f32 %v349_v12 }
 0x31f   :  { %v346_v13 = vpop.xlane.xlu2 %345 }
 0x320   :  { %v348_v15 = vsub.f32 %v338_v46, %v346_v13 }
 0x322   :  { %v1355_v16 = vpop.eup %1354  ;;  %v351_v17 = vmul.f32 1.442695, %v348_v15 }
 0x323   :  { %v353_v18 = vsel %vm270_vm10, %v1355_v16, 0.0 }
 0x324   :  { %1356 = vpow2.f32 %v351_v17  ;;  %354 = vadd.xlane.f32.xlu1 %v353_v18  ;;  %v1275_v17 = vld [vmem:[#allocation5 + $0x18] sm:$0xff]  ;;  %v1274_v18 = vld [vmem:[#allocation5 + $0x10] sm:$0xff] }
 0x325   :  { %602 = vmatpush.bf16.msra.mxu0 %v1275_v17 }
 0x327   :  { %v504_v14 = vpop.xlane.xlu2 %503 }
 0x328   :  { %v508_v19 = vsub.f32 %v497_v48, %v504_v14  ;;  %v1273_v14 = vld [vmem:[#allocation5 + $0x8] sm:$0xff] }
 0x329   :  { %603 = vmatpush.bf16.msra.mxu0 %v1274_v18  ;;  %v1134_v18 = vld [vmem:[%s1973_s5] sm:$0xf] }
 0x32a   :  { %v1357_v21 = vpop.eup %1356  ;;  %v510_v22 = vmul.f32 1.442695, %v508_v19  ;;  %v1272_v19 = vld [vmem:[#allocation5] sm:$0xff] }
 0x32b   :  { %v356_v23 = vsel %vm270_vm10, %v1357_v21, 0.0 }
 0x32c   :  { %1358 = vpow2.f32 %v510_v22  ;;  %357 = vadd.xlane.f32.xlu0 %v356_v23 }
 0x32d   :  { %604 = vmatpush.bf16.msra.mxu0 %v1273_v14  ;;  %v1278_v14 = vld [vmem:[%s1973_s5 + $0xc] sm:$0xf0] }
 0x32f   :  { %v295_v24 = vpop.permute.xlu2 %294 }
 0x330   :  { %v300_v25 = vsel %vm244_vm8, %v295_v24, 0 }
 0x331   :  { %309 = vmatpush.bf16.msrb.mxu2 %v300_v25  ;;  %605 = vmatpush.bf16.msra.mxu0 %v1272_v19  ;;  %v1276_v19 = vld [vmem:[%s1973_s5 + $0x4] sm:$0xf] }
 0x332   :  { %v1359_v26 = vpop.eup %1358 }
 0x333   :  { %v285_v27 = vpop.xlane.xlu1 %284  ;;  %v514_v28 = vsel %vm270_vm10, %v1359_v26, 0.0 }
 0x334   :  { %515 = vadd.xlane.f32.xlu0 %v514_v28  ;;  %1360 = vrcp.f32 %v285_v27 }
 0x33a   :  { %v1361_v34 = vpop.eup %1360 }
 0x33b   :  { %v288_v29 = vpop.xlane.xlu0 %287  ;;  %v507_v31 = vpop.xlane.xlu1 %506  ;;  %v291_v36 = vmul.f32 %v1361_v34, %v1714_v55 }
 0x33c   :  { %1362 = vrcp.f32 %v288_v29  ;;  %v509_v32 = vsub.f32 %v499_v58, %v507_v31 }
 0x33d   :  { %525 = vrot.lane.b32.xlu1 %v1686_v20, %s1539_s23 }
 0x33e   :  { %v512_v33 = vmul.f32 1.442695, %v509_v32 }
 0x340   :  { %1364 = vpow2.f32 %v512_v33 }
 0x342   :  { %v1363_v35 = vpop.eup %1362 }
 0x343   :  { %v292_v37 = vmul.f32 %v1363_v35, %v1349_v60 }
 0x345   :  { %v293_v38 = vpack.c.bf16 %v292_v37, %v291_v36  ;;  %v449_v43 = vpop.xlane.xlu0 %448 }
 0x346   :  { %v1365_v39 = vpop.eup %1364 }
 0x347   :  { %1108 = vmatmul.msk.bf16.vlgmr.msrb.gmra.mxu2 %vm270_vm10, %v293_v38  ;;  %v517_v40 = vsel %vm270_vm10, %v1365_v39, 0.0 }
 0x348   :  { %518 = vadd.xlane.f32.xlu0 %v517_v40 }
 0x353   :  { %v365_v41 = vpop.permute.xlu1 %364 }
 0x354   :  { %v370_v42 = vsel %vm244_vm8, %v365_v41, 0 }
 0x355   :  { %379 = vmatpush.bf16.msra.mxu2 %v370_v42 }
 0x35c   :  { %455 = vrot.lane.b32.xlu0 %v1686_v20, %s1538_s17 }
 0x368   :  { %v446_v55 = vpop.xlane.xlu2 %445 }
 0x397   :  { %v355_v44 = vpop.xlane.xlu1 %354 }
 0x398   :  { %1366 = vrcp.f32 %v355_v44 }
 0x39e   :  { %v1367_v46 = vpop.eup %1366 }
 0x39f   :  { %v358_v45 = vpop.xlane.xlu0 %357  ;;  %v361_v48 = vmul.f32 %v1367_v46, %v1355_v16  ;;  %v1290_v46 = vld [vmem:[%s1973_s5 + $0x6c] sm:$0xf0] }
 0x3a0   :  { %1368 = vrcp.f32 %v358_v45 }
 0x3a6   :  { %v1369_v47 = vpop.eup %1368 }
 0x3a7   :  { %v362_v49 = vmul.f32 %v1369_v47, %v1357_v21  ;;  %v516_v53 = vpop.xlane.xlu0 %515  ;;  %v1288_v47 = vld [vmem:[%s1973_s5 + $0x64] sm:$0xf] }
 0x3a8   :  { %1370 = vrcp.f32 %v516_v53  ;;  %v1289_v53 = vld [vmem:[%s1973_s5 + $0x6c] sm:$0xf] }
 0x3a9   :  { %v363_v50 = vpack.c.bf16 %v362_v49, %v361_v48  ;;  %v1184_v48 = vld [vmem:[%s1973_s5 + $0x70] sm:$0xf0]  ;;  %v1190_v49 = vld [vmem:[%s1973_s5 + $0x68] sm:$0xf] }
 0x3ab   :  { %1110 = vmatmul.msk.bf16.vlgmr.msra.gmra.mxu2 %vm270_vm10, %v363_v50  ;;  %v1291_v50 = vld [vmem:[%s1973_s5 + $0x74] sm:$0xf0] }
 0x3ae   :  { %v1371_v20 = vpop.eup %1370 }
 0x3af   :  { %v526_v51 = vpop.permute.xlu1 %525  ;;  %v522_v57 = vmul.f32 %v1371_v20, %v1359_v26 }
 0x3b0   :  { %v531_v52 = vsel %vm244_vm8, %v526_v51, 0  ;;  %v1187_v51 = vor.u32 %v1288_v47, %v1184_v48 }
 0x3b1   :  { %540 = vmatpush.bf16.msrb.mxu2 %v531_v52  ;;  %v1191_v52 = vor.u32 %v1291_v50, %v1190_v49 }
 0x3b2   :  { %772 = vmatpush.bf16.msra.mxu3 %v1187_v51 }
 0x3b5   :  { %786 = vmatpush.bf16.msra.mxu2 %v1191_v52 }
 0x3bb   :  { %v519_v54 = vpop.xlane.xlu0 %518 }
 0x3bc   :  { %1372 = vrcp.f32 %v519_v54  ;;  %v1192_v54 = vld [vmem:[%s1973_s5 + $0x78] sm:$0xf0] }
 0x3bd   :  { %1374 = vrcp.f32 %v446_v55  ;;  %v1195_v20 = vor.u32 %v1289_v53, %v1192_v54  ;;  %v1166_v55 = vld [vmem:[%s1973_s5 + $0x40] sm:$0xf] }
 0x3be   :  { %1376 = vrcp.f32 %v449_v43 }
 0x3bf   :  { %800 = vmatpush.bf16.msrb.mxu0 %v1195_v20 }
 0x3c2   :  { %v1373_v56 = vpop.eup %1372 }
 0x3c3   :  { %v523_v58 = vmul.f32 %v1373_v56, %v1365_v39  ;;  %v1375_v60 = vpop.eup %1374  ;;  %v1286_v56 = vld [vmem:[%s1973_s5 + $0x4c] sm:$0xf0] }
 0x3c4   :  { %v1377_v61 = vpop.eup %1376  ;;  %v452_v62 = vmul.f32 %v1375_v60, %v1728_v8  ;;  %v1174_v60 = vld [vmem:[%s1973_s5 + $0x48] sm:$0xf] }
 0x3c5   :  { %v524_v59 = vpack.c.bf16 %v523_v58, %v522_v57  ;;  %v453_v1 = vmul.f32 %v1377_v61, %v1722_v3  ;;  %v1284_v57 = vld [vmem:[%s1973_s5 + $0x44] sm:$0xf]  ;;  %v1167_v58 = vor.u32 %v1286_v56, %v1166_v55  ;;  %v1287_v61 = vld [vmem:[%s1973_s5 + $0x54] sm:$0xf0]  ;;  %v1298_v56 = vld [vmem:[%s1974_s6 + $0x30] sm:$0xff] }
 0x3c6   :  { %v1299_v55 = vld [vmem:[%s1974_s6 + $0x38] sm:$0xff] }
 0x3c7   :  { %1114 = vmatmul.msk.bf16.vlgmr.msrb.gmra.mxu2 %vm270_vm10, %v524_v59  ;;  %v454_v5 = vpack.c.bf16 %v453_v1, %v452_v62  ;;  %v1168_v59 = vld [vmem:[%s1973_s5 + $0x50] sm:$0xf0]  ;;  %v1285_v1 = vld [vmem:[%s1973_s5 + $0x4c] sm:$0xf] }
 0x3c8   :  { %v1171_v62 = vor.u32 %v1284_v57, %v1168_v59  ;;  %v1307_v57 = vld [vmem:[%s1974_s6 + $0x78] sm:$0xff]  ;;  %v1306_v59 = vld [vmem:[%s1974_s6 + $0x70] sm:$0xff] }
 0x3ca   :  { %v311_v6 = vpop.f32.mrf.mxu2  ;;  %773 = vmatpush.bf16.msra.mxu3 %v1171_v62  ;;  %v1295_v62 = vld [vmem:[%s1974_s6 + $0x18] sm:$0xff] }
 0x3ce   :  { %v456_v63 = vpop.permute.xlu0 %455 }
 0x3cf   :  { %v461_v4 = vsel %vm244_vm8, %v456_v63, 0  ;;  %v1175_v63 = vor.u32 %v1287_v61, %v1174_v60  ;;  %v1296_v60 = vld [vmem:[%s1974_s6 + $0x20] sm:$0xff]  ;;  %v1305_v61 = vld [vmem:[%s1974_s6 + $0x68] sm:$0xff] }
 0x3d0   :  { %470 = vmatpush.bf16.msrb.mxu1 %v461_v4  ;;  %v1176_v4 = vld [vmem:[%s1973_s5 + $0x58] sm:$0xf0] }
 0x3d1   :  { %787 = vmatpush.bf16.msra.mxu2 %v1175_v63 }
 0x3d2   :  { %v313_v7 = vpop.f32.mrf.mxu2 }
 0x3d3   :  { %1112 = vmatmul.msk.bf16.vlgmr.msrb.gmra.mxu1 %vm270_vm10, %v454_v5  ;;  %v1179_v5 = vor.u32 %v1285_v1, %v1176_v4  ;;  %v1304_v1 = vld [vmem:[%s1974_s6 + $0x60] sm:$0xff] }
 0x3d5   :  { %801 = vmatpush.bf16.msrb.mxu0 %v1179_v5  ;;  %v1294_v5 = vld [vmem:[%s1974_s6 + $0x10] sm:$0xff] }
 0x42e   :  { %v381_v9 = vpop.f32.mrf.mxu2 }
 0x436   :  { %v383_v10 = vpop.f32.mrf.mxu2 }
 0x44a   :  { %v542_v11 = vpop.f32.mrf.mxu2 }
 0x44b   :  { %v1328_v3 = vpack.i.bf16 %v542_v11, %v381_v9  ;;  %v1280_v9 = vld [vmem:[%s1973_s5 + $0x24] sm:$0xf]  ;;  %v1152_v11 = vld [vmem:[%s1973_s5 + $0x30] sm:$0xf0] }
 0x450   :  { %v472_v12 = vpop.f32.mrf.mxu1 }
 0x452   :  { %v544_v13 = vpop.f32.mrf.mxu2 }
 0x453   :  { %v1333_v15 = vpack.i.bf16 %v544_v13, %v383_v10  ;;  %v1283_v13 = vld [vmem:[%s1973_s5 + $0x34] sm:$0xf0] }
 0x455   :  { %1334 = vrot.lane.b32.xlu0 %v1333_v15, %s1536_s20  ;;  %v1155_v15 = vor.u32 %v1280_v9, %v1152_v11 }
 0x457   :  { %774 = vmatpush.bf16.msra.mxu3 %v1155_v15 }
 0x458   :  { %v474_v8 = vpop.f32.mrf.mxu1 }
 0x459   :  { %v1323_v16 = vpack.i.bf16 %v474_v8, %v313_v7  ;;  %v1282_v7 = vld [vmem:[%s1973_s5 + $0x2c] sm:$0xf0] }
 0x45b   :  { %1324 = vrot.lane.b32.xlu1 %v1323_v16, %s1539_s23  ;;  %v1281_v16 = vld [vmem:[%s1973_s5 + $0x2c] sm:$0xf] }
 0x463   :  { %1329 = vrot.lane.b32.xlu1 %v1328_v3, %s1538_s17  ;;  %v1160_v3 = vld [vmem:[%s1973_s5 + $0x38] sm:$0xf0] }
 0x464   :  { %v1163_v17 = vor.u32 %v1281_v16, %v1160_v3  ;;  %v1292_v16 = vld [vmem:[%s1974_s6] sm:$0xff] }
 0x466   :  { %802 = vmatpush.bf16.msrb.mxu0 %v1163_v17 }
 0x4c7   :  { %v1335_v24 = vpop.permute.xlu0 %1334 }
 0x4c8   :  { %v1337_v28 = vunpack.i.h.bf16 %v1335_v24  ;;  %v1336_v29 = vunpack.i.l.bf16 %v1335_v24  ;;  %v1142_v24 = vld [vmem:[%s1973_s5 + $0x8] sm:$0xf] }
 0x4cd   :  { %v1325_v21 = vpop.permute.xlu1 %1324 }
 0x4ce   :  { %v1327_v22 = vunpack.i.h.bf16 %v1325_v21  ;;  %v1326_v23 = vunpack.i.l.bf16 %v1325_v21 }
 0x4d0   :  { %v559_v31 = vsel %vm250_vm9, %v472_v12, %v1327_v22  ;;  %v398_v32 = vsel %vm250_vm9, %v311_v6, %v1326_v23  ;;  %v1150_v6 = vld [vmem:[%s1973_s5 + $0x20] sm:$0xf]  ;;  %v1158_v12 = vld [vmem:[%s1973_s5 + $0x28] sm:$0xf]  ;;  %v1135_v22 = vor.u32 %v1278_v14, %v1134_v18  ;;  %v1136_v23 = vld [vmem:[%s1973_s5 + $0x10] sm:$0xf0] }
 0x4d1   :  { %v1151_v10 = vor.u32 %v1282_v7, %v1150_v6  ;;  %v1159_v8 = vor.u32 %v1283_v13, %v1158_v12  ;;  %v1303_v7 = vld [vmem:[%s1974_s6 + $0x58] sm:$0xff]  ;;  %v1302_v13 = vld [vmem:[%s1974_s6 + $0x50] sm:$0xff]  ;;  %v1301_v14 = vld [vmem:[%s1974_s6 + $0x48] sm:$0xff] }
 0x4d3   :  { %788 = vmatpush.bf16.msra.mxu2 %v1159_v8 }
 0x4d5   :  { %v1330_v25 = vpop.permute.xlu1 %1329 }
 0x4d6   :  { %v1332_v26 = vunpack.i.h.bf16 %v1330_v25  ;;  %v1331_v27 = vunpack.i.l.bf16 %v1330_v25  ;;  %v1279_v25 = vld [vmem:[%s1973_s5 + $0x14] sm:$0xf0] }
 0x4d8   :  { %v400_v33 = vsel %vm399_vm11, %v398_v32, %v1331_v27  ;;  %v560_v34 = vsel %vm399_vm11, %v559_v31, %v1332_v26  ;;  %v1139_v27 = vor.u32 %v1276_v19, %v1136_v23  ;;  %v1144_v31 = vld [vmem:[%s1973_s5 + $0x18] sm:$0xf0] }
 0x4d9   :  { %v402_v35 = vsel %vm401_vm12, %v400_v33, %v1336_v29  ;;  %v561_v36 = vsel %vm401_vm12, %v560_v34, %v1337_v28  ;;  %v1143_v28 = vor.u32 %v1279_v25, %v1142_v24  ;;  %v1277_v29 = vld [vmem:[%s1973_s5 + $0xc] sm:$0xf] }
 0x4da   :  { %v562_v37 = vpack.c.bf16 %v561_v36, %v402_v35  ;;  %v1147_v32 = vor.u32 %v1277_v29, %v1144_v31  ;;  %775 = vmatpush.bf16.msra.mxu3 %v1139_v27 }
 0x4db   :  { %789 = vmatpush.bf16.msra.mxu2 %v1143_v28 }
 0x4dc   :  { %1131 = vmatmul.msk.bf16.vlgmr.msra.gmra.mxu0 %vm101_vm0, %v562_v37 }
 0x4dd   :  { %803 = vmatpush.bf16.msrb.mxu0 %v1147_v32 }
 0x4de   :  { %1034 = vmatpush.bf16.msrb.mxu3 %v1307_v57 }
 0x4e2   :  { %1035 = vmatpush.bf16.msrb.mxu3 %v1306_v59 }
 0x4e6   :  { %1036 = vmatpush.bf16.msrb.mxu3 %v1305_v61 }
 0x4ea   :  { %1037 = vmatpush.bf16.msrb.mxu3 %v1304_v1 }
 0x4ee   :  { %1038 = vmatpush.bf16.msrb.mxu3 %v1303_v7 }
 0x4f2   :  { %1039 = vmatpush.bf16.msrb.mxu3 %v1302_v13 }
 0x4f6   :  { %1040 = vmatpush.bf16.msrb.mxu3 %v1301_v14 }
 0x559   :  { %v607_v38 = vpop.f32.mrf.mxu0 }
 0x55a   :  { %v1758_v39 = vadd.f32 %v607_v38, %v1614_v0  ;;  %v1182_v0 = vld [vmem:[%s1973_s5 + $0x60] sm:$0xf] }
 0x55c   :  { %v614_v40 = vmul.f32 %v1758_v39, %v1758_v39 }
 0x55e   :  { %v616_v41 = vsel %vm101_vm0, %v614_v40, 0.0 }
 0x55f   :  { %617 = vadd.xlane.f32.xlu1 %v616_v41 }
 0x561   :  { %v609_v42 = vpop.f32.mrf.mxu0 }
 0x562   :  { %v1764_v43 = vadd.f32 %v609_v42, %v1618_v2  ;;  %v1183_v2 = vor.u32 %v1290_v46, %v1182_v0 }
 0x564   :  { %v615_v44 = vmul.f32 %v1764_v43, %v1764_v43  ;;  %758 = vmatpush.bf16.msra.mxu1 %v1183_v2 }
 0x566   :  { %v619_v45 = vsel %vm101_vm0, %v615_v44, 0.0 }
 0x567   :  { %620 = vadd.xlane.f32.xlu0 %v619_v45 }
 0x568   :  { %759 = vmatpush.bf16.msra.mxu1 %v1167_v58  ;;  %v1297_v58 = vld [vmem:[%s1974_s6 + $0x28] sm:$0xff] }
 0x56c   :  { %760 = vmatpush.bf16.msra.mxu1 %v1151_v10  ;;  %v1293_v10 = vld [vmem:[%s1974_s6 + $0x8] sm:$0xff] }
 0x570   :  { %761 = vmatpush.bf16.msra.mxu1 %v1135_v22  ;;  %v1300_v22 = vld [vmem:[%s1974_s6 + $0x40] sm:$0xff]  ;;  %s1540_s6 = smov [#allocation10]  }
 0x571   :  { %1041 = vmatpush.bf16.msrb.mxu3 %v1300_v22  ;;  %s1056_s19 = sshll.u32 %s1540_s6, 4  ;;  %s1057_s19 = int_to_ptr.vmem [resolvable:$true] %s1056_s19 }
 0x574   :  { %1020 = vmatpush.bf16.msrb.mxu1 %v1299_v55 }
 0x578   :  { %1021 = vmatpush.bf16.msrb.mxu1 %v1298_v56 }
 0x57c   :  { %1022 = vmatpush.bf16.msrb.mxu1 %v1297_v58 }
 0x580   :  { %1023 = vmatpush.bf16.msrb.mxu1 %v1296_v60 }
 0x584   :  { %1024 = vmatpush.bf16.msrb.mxu1 %v1295_v62 }
 0x588   :  { %1025 = vmatpush.bf16.msrb.mxu1 %v1294_v5 }
 0x58c   :  { %1026 = vmatpush.bf16.msrb.mxu1 %v1293_v10 }
 0x590   :  { %1027 = vmatpush.bf16.msrb.mxu1 %v1292_v16 }
 0x5d2   :  { %v618_v21 = vpop.xlane.xlu1 %617 }
 0x5d3   :  { %v622_v26 = vmul.f32 %v618_v21, %v1660_v30 }
 0x5d5   :  { %v624_v33 = vadd.f32 1e-05, %v622_v26 }
 0x5d7   :  { %1378 = vrsqrt.f32 %v624_v33  ;;  %vm632_vm14 = vweird.f32 %v624_v33 }
 0x5da   :  { %v621_v34 = vpop.xlane.xlu0 %620 }
 0x5db   :  { %v623_v35 = vmul.f32 %v621_v34, %v1660_v30  ;;  %v1339_v30 = vld [vmem:[%s1970_s2] ss:$0 sm:$0xff] }
 0x5dd   :  { %v1379_v36 = vpop.eup %1378  ;;  %v625_v37 = vadd.f32 1e-05, %v623_v35 }
 0x5de   :  { %v627_v38 = vmul.f32 %v1379_v36, %v624_v33  ;;  %vm633_vm13 = vweird.f32 %v1379_v36 }
 0x5df   :  { %1380 = vrsqrt.f32 %v625_v37  ;;  %vm634_vm15 = vmor %vm632_vm14, %vm633_vm13  ;;  %vm642_vm2 = vweird.f32 %v625_v37 }
 0x5e0   :  { %v628_v40 = vmul.f32 %v1379_v36, %v627_v38 }
 0x5e2   :  { %v629_v41 = vmul.f32 0.5, %v628_v40 }
 0x5e4   :  { %v630_v42 = vsub.f32 1.5, %v629_v41 }
 0x5e5   :  { %v1381_v44 = vpop.eup %1380 }
 0x5e6   :  { %v637_v45 = vmul.f32 %v1381_v44, %v625_v37  ;;  %v631_v0 = vmul.f32 %v1379_v36, %v630_v42  ;;  %vm643_vm1 = vweird.f32 %v1381_v44 }
 0x5e7   :  { %vm644_vm3 = vmor %vm642_vm2, %vm643_vm1 }
 0x5e8   :  { %v638_v46 = vmul.f32 %v1381_v44, %v637_v45  ;;  %v635_v2 = vsel %vm634_vm15, %v1379_v36, %v631_v0 }
 0x5e9   :  { %v646_v50 = vmul.f32 %v635_v2, %v1758_v39 }
 0x5ea   :  { %v639_v47 = vmul.f32 0.5, %v638_v46 }
 0x5eb   :  { %v652_v53 = vmul.f32 %v1339_v30, %v646_v50 }
 0x5ec   :  { %v640_v48 = vsub.f32 1.5, %v639_v47 }
 0x5ee   :  { %v641_v49 = vmul.f32 %v1381_v44, %v640_v48 }
 0x5f0   :  { %v645_v51 = vsel %vm644_vm3, %v1381_v44, %v641_v49 }
 0x5f1   :  { %v647_v52 = vmul.f32 %v645_v51, %v1764_v43 }
 0x5f3   :  { %v653_v54 = vmul.f32 %v1339_v30, %v647_v52 }
 0x5f5   :  { %v654_v20 = vpack.c.bf16 %v653_v54, %v652_v53 }
 0x5f7   :  { %1196 = vmatmul.msk.bf16.vlgmr.msra.gmra.mxu1 %vm101_vm0, %v654_v20  ;;  %1197 = vmatmul.msk.bf16.vlgmr.msra.gmra.mxu3 %vm101_vm0, %v654_v20 }
 0x5f8   :  { %1198 = vmatmul.msk.bf16.vlgmr.msra.gmra.mxu2 %vm101_vm0, %v654_v20  ;;  %1199 = vmatmul.msk.bf16.vlgmr.msrb.gmra.mxu0 %vm101_vm0, %v654_v20 }
 0x674   :  { %v1900_v63 = vpop.f32.mrf.mxu1 }
 0x675   :  { %v810_v4 = vsub.f32 0.0, %v1900_v63  ;;  %v805_v56 = vpop.f32.mrf.mxu0 }
 0x677   :  { %v814_v6 = vmul.f32 1.442695, %v810_v4 }
 0x679   :  { %1382 = vpow2.f32 %v814_v6 }
 0x67a   :  { %v1912_v9 = vpop.f32.mrf.mxu3 }
 0x67b   :  { %v811_v11 = vsub.f32 0.0, %v1912_v9  ;;  %v791_v46 = vpop.f32.mrf.mxu2 }
 0x67c   :  { %v1918_v12 = vpop.f32.mrf.mxu1 }
 0x67d   :  { %v816_v15 = vmul.f32 1.442695, %v811_v11  ;;  %v812_v8 = vsub.f32 0.0, %v1918_v12 }
 0x67f   :  { %v1383_v3 = vpop.eup %1382  ;;  %1384 = vpow2.f32 %v816_v15  ;;  %v818_v17 = vmul.f32 1.442695, %v812_v8 }
 0x680   :  { %v822_v18 = vadd.f32 1.0, %v1383_v3 }
 0x681   :  { %1386 = vpow2.f32 %v818_v17 }
 0x682   :  { %1388 = vrcp.f32 %v822_v18  ;;  %v1930_v19 = vpop.f32.mrf.mxu3  ;;  %v837_v38 = vand.u32 2147483648, %v822_v18  ;;  %vm831_vm5 = vweird.f32 %v822_v18  ;;  %v835_v42 = vand.u32 2147483647, %v822_v18 }
 0x683   :  { %v813_v21 = vsub.f32 0.0, %v1930_v19  ;;  %v793_v16 = vpop.f32.mrf.mxu2 }
 0x684   :  { %v838_v2 = vor.u32 1.1754944e-38, %v837_v38  ;;  %vm836_vm8 = vcmp.eq.f32.partialorder %v835_v42, 8.507059e+37 }
 0x685   :  { %v1385_v23 = vpop.eup %1384  ;;  %v820_v24 = vmul.f32 1.442695, %v813_v21 }
 0x686   :  { %v823_v25 = vadd.f32 1.0, %v1385_v23 }
 0x687   :  { %v1387_v26 = vpop.eup %1386  ;;  %1390 = vpow2.f32 %v820_v24  ;;  %v807_v24 = vpop.f32.mrf.mxu0 }
 0x688   :  { %v1389_v27 = vpop.eup %1388  ;;  %1392 = vrcp.f32 %v823_v25  ;;  %v824_v29 = vadd.f32 1.0, %v1387_v26  ;;  %v849_v48 = vand.u32 2147483647, %v823_v25  ;;  %v851_v50 = vand.u32 2147483648, %v823_v25 }
 0x689   :  { %v827_v28 = vmul.f32 %v1389_v27, %v822_v18  ;;  %vm832_vm4 = vweird.f32 %v1389_v27  ;;  %vm845_vm10 = vweird.f32 %v823_v25 }
 0x68a   :  { %1394 = vrcp.f32 %v824_v29  ;;  %vm1936_vm6 = vmor %vm831_vm5, %vm832_vm4  ;;  %v865_v51 = vand.u32 2147483648, %v824_v29  ;;  %v863_v54 = vand.u32 2147483647, %v824_v29  ;;  %vm1946_vm12 = vcmp.eq.f32.partialorder %v849_v48, 8.507059e+37 }
 0x68b   :  { %v828_v31 = vsub.f32 1.0, %v827_v28  ;;  %vm859_vm13 = vweird.f32 %v824_v29  ;;  %v852_v61 = vor.u32 1.1754944e-38, %v851_v50 }
 0x68c   :  { %v866_v62 = vor.u32 1.1754944e-38, %v865_v51  ;;  %vm864_vm15 = vcmp.eq.f32.partialorder %v863_v54, 8.507059e+37 }
 0x68d   :  { %v1391_v32 = vpop.eup %1390  ;;  %v829_v33 = vmul.f32 %v1389_v27, %v828_v31 }
 0x68e   :  { %v1393_v34 = vpop.eup %1392  ;;  %v825_v35 = vadd.f32 1.0, %v1391_v32 }
 0x68f   :  { %v841_v36 = vmul.f32 %v1393_v34, %v823_v25  ;;  %v830_v37 = vadd.f32 %v1389_v27, %v829_v33  ;;  %vm846_vm7 = vweird.f32 %v1393_v34 }
 0x690   :  { %1396 = vrcp.f32 %v825_v35  ;;  %v1395_v40 = vpop.eup %1394  ;;  %vm1942_vm11 = vmor %vm845_vm10, %vm846_vm7  ;;  %v879_v6 = vand.u32 2147483648, %v825_v35  ;;  %v877_v11 = vand.u32 2147483647, %v825_v35  ;;  %vm873_vm2 = vweird.f32 %v825_v35 }
 0x691   :  { %v842_v41 = vsub.f32 1.0, %v841_v36  ;;  %v855_v44 = vmul.f32 %v1395_v40, %v824_v29  ;;  %v834_v47 = vsel %vm1936_vm6, %v1389_v27, %v830_v37  ;;  %vm860_vm9 = vweird.f32 %v1395_v40 }
 0x692   :  { %v839_v20 = vsel %vm836_vm8, %v838_v2, %v834_v47  ;;  %vm861_vm14 = vmor %vm859_vm13, %vm860_vm9  ;;  %v880_v17 = vor.u32 1.1754944e-38, %v879_v6  ;;  %vm878_vm4 = vcmp.eq.f32.partialorder %v877_v11, 8.507059e+37 }
 0x693   :  { %v843_v0 = vmul.f32 %v1393_v34, %v842_v41  ;;  %v856_v49 = vsub.f32 1.0, %v855_v44  ;;  %v882_v4 = vmul.f32 %v839_v20, %v1900_v63 }
 0x695   :  { %v844_v30 = vadd.f32 %v1393_v34, %v843_v0  ;;  %v857_v53 = vmul.f32 %v1395_v40, %v856_v49  ;;  %v886_v3 = vmul.f32 %v882_v4, %v791_v46 }
 0x696   :  { %v1397_v52 = vpop.eup %1396 }
 0x697   :  { %v869_v55 = vmul.f32 %v1397_v52, %v825_v35  ;;  %v858_v59 = vadd.f32 %v1395_v40, %v857_v53  ;;  %v848_v60 = vsel %vm1942_vm11, %v1393_v34, %v844_v30  ;;  %vm874_vm1 = vweird.f32 %v1397_v52 }
 0x698   :  { %v853_v13 = vsel %vm1946_vm12, %v852_v61, %v848_v60  ;;  %vm875_vm3 = vmor %vm873_vm2, %vm874_vm1 }
 0x699   :  { %v870_v1 = vsub.f32 1.0, %v869_v55  ;;  %v862_v5 = vsel %vm861_vm14, %v1395_v40, %v858_v59  ;;  %v883_v63 = vmul.f32 %v853_v13, %v1912_v9 }
 0x69a   :  { %v867_v7 = vsel %vm864_vm15, %v866_v62, %v862_v5 }
 0x69b   :  { %v871_v10 = vmul.f32 %v1397_v52, %v870_v1  ;;  %v884_v15 = vmul.f32 %v867_v7, %v1918_v12  ;;  %v887_v25 = vmul.f32 %v883_v63, %v805_v56 }
 0x69d   :  { %v872_v8 = vadd.f32 %v1397_v52, %v871_v10  ;;  %v888_v18 = vmul.f32 %v884_v15, %v793_v16 }
 0x69f   :  { %v876_v14 = vsel %vm875_vm3, %v1397_v52, %v872_v8  ;;  %v890_v22 = vpack.c.bf16 %v888_v18, %v886_v3 }
 0x6a0   :  { %v881_v21 = vsel %vm878_vm4, %v880_v17, %v876_v14 }
 0x6a1   :  { %v885_v23 = vmul.f32 %v881_v21, %v1930_v19  ;;  %1028 = vmatmul.bf16.vlgmr.msrb.gmra.mxu1 %v890_v22 }
 0x6a3   :  { %v889_v26 = vmul.f32 %v885_v23, %v807_v24 }
 0x6a5   :  { %v891_v12 = vpack.c.bf16 %v889_v26, %v887_v25 }
 0x6a7   :  { %1042 = vmatmul.bf16.vlgmr.msrb.gmra.mxu3 %v891_v12 }
 0x71e   :  { %v1029_v27 = vpop.f32.mrf.mxu1 }
 0x726   :  { %v1031_v9 = vpop.f32.mrf.mxu1 }
 0x72a   :  { %v1043_v28 = vpop.f32.mrf.mxu3 }
 0x72b   :  { %v1044_v29 = vadd.f32 %v1043_v28, %v1029_v27 }
 0x72d   :  { %v1048_v31 = vadd.f32 %v1044_v29, %v1758_v39 }
 0x72f   :  { %1050 = vst.msk [vmem:[#allocation10] sm:$0xff] %vm101_vm0, %v1048_v31 }
 0x732   :  { %v1045_v32 = vpop.f32.mrf.mxu3 }
 0x733   :  { %v1046_v19 = vadd.f32 %v1045_v32, %v1031_v9 }
 0x735   :  { %v1049_v33 = vadd.f32 %v1046_v19, %v1764_v43 }
 0x737   :  { %1051 = vst.msk [vmem:[#allocation10 + $0x8] sm:$0xff] %vm101_vm0, %v1049_v33 }
 0x738   :  { %1064 = dma.vmem_to_hbm [thread:$0]  %s1057_s19, 256, %s1059_s22, [#allocation4], %s1530_s21, %s1530_s21, %s1531_s4  }
 0x739   :  { %1524 = dma.done.wait [#allocation4], 256  }
 0x73a   :  { %1525 = vsyncadd [#allocation4], 4294967040 }
 0x73b   :  { %1069 = vsyncpa [#allocation3], 1 }
 0x73c   :  { %1070 = vsyncpa [#allocation6], 1 }
 0x73d   :  { %1071 = vsyncpa [#allocation9], 1 }
 0x73e   :  { %1072 = vsyncpa [#allocation4], 1 }

</bundles_post_ra>
